<compile_context>
chip_gen: v7x
topology: tpu7x:2x2x1
jax: 0.10.0
libtpu: 0.0.40
codegen_flags: <defaults>
</compile_context>

<pallas_src>
import jax
import jax.numpy as jnp
from jax.experimental import pallas as pl
from jax.experimental.pallas import tpu as pltpu

CONSTELLATION_ORDER = 16   # aeParam.constellationOrder (assumed; see TODO above)
HIDDEN = 256
IN_FEATURES = 2


# --------------------------------------------------------------------------
# Kernel: whole 5-layer MLP fused, weights resident in VMEM, batch tiled.
# --------------------------------------------------------------------------
def _decoder_mlp_kernel(x_ref,
                        w1_ref, b1_ref,
                        w2_ref, b2_ref,
                        w3_ref, b3_ref,
                        w4_ref, b4_ref,
                        w5_ref, b5_ref,
                        o_ref):
    x = x_ref[...]          # (bb, 2)   f32
    w1 = w1_ref[...]        # (2, 256)  f32

    # Layer 1: K=2 contraction -> two VPU broadcast FMAs (skip near-empty MXU).
    h = x[:, 0:1] * w1[0:1, :] + x[:, 1:2] * w1[1:2, :] + b1_ref[...]
    h = jnp.maximum(h, 0.0)

    # Layers 2-4: bf16 MXU inputs, f32 accumulate, f32 bias/ReLU (v5e-safe).
    for w_ref, b_ref in ((w2_ref, b2_ref), (w3_ref, b3_ref), (w4_ref, b4_ref)):
        h = jnp.dot(h.astype(jnp.bfloat16), w_ref[...],
                    preferred_element_type=jnp.float32) + b_ref[...]
        h = jnp.maximum(h, 0.0)

    # Layer 5: narrow (16-wide) logits written directly -> minimal HBM bytes.
    out = jnp.dot(h.astype(jnp.bfloat16), w5_ref[...],
                  preferred_element_type=jnp.float32) + b5_ref[...]
    o_ref[...] = out.astype(o_ref.dtype)


# --------------------------------------------------------------------------
# Wrapper helpers
# --------------------------------------------------------------------------
def _pick_block_batch(batch, requested, target_grid_steps=4):
    """Clamp the requested batch tile so the grid keeps >= target steps
    (megacore parallelism + writeback/compute overlap); multiple of 8 rows."""
    bb = min(requested, pl.cdiv(batch, target_grid_steps))
    bb = max(8, ((bb + 7) // 8) * 8)
    return bb


def _vmem_limit_bytes(block_batch):
    """Actual footprint + margin (replaces the oversized fixed 48 MiB cap)."""
    # x / out tiles: lane-padded to 128 lanes in VMEM, f32, double-buffered.
    io_bytes = 2 * 2 * block_batch * 128 * 4
    # Activations: f32 h + bf16 copy, x2 for overlapping live ranges.
    act_bytes = 2 * block_batch * HIDDEN * (4 + 2)
    # Weights + biases, double-buffered (~0.9 MiB total).
    w_bytes = 2 * (IN_FEATURES * HIDDEN * 4
                   + 3 * HIDDEN * HIDDEN * 2
                   + HIDDEN * CONSTELLATION_ORDER * 2
                   + 4 * HIDDEN * 4
                   + 2 * CONSTELLATION_ORDER * 4)
    total = io_bytes + act_bytes + w_bytes
    # 50% margin + 2 MiB internal scratch; stay well under v7x scoped default.
    return int(min(32 * 1024 * 1024, max(8 * 1024 * 1024, 1.5 * total + 2 * 1024 * 1024)))


def decoder_forward(rx_sig, params, *, block_batch=2048, target_grid_steps=4):
    """Run the Decoder MLP as one fused Pallas kernel.

    rx_sig: [B, 2] float32
    params: w1 [2,256] f32, b1 [1,256] f32,
            w2..w4 [256,256] bf16, b2..b4 [1,256] f32,
            w5 [256,16] bf16, b5 [1,16] f32
    """
    B, F = rx_sig.shape
    assert F == IN_FEATURES
    n_out = params["w5"].shape[1]

    bb = _pick_block_batch(B, block_batch, target_grid_steps)
    b_pad = pl.cdiv(B, bb) * bb
    if b_pad != B:
        rx_sig = jnp.pad(rx_sig, ((0, b_pad - B), (0, 0)))
    grid = (b_pad // bb,)

    def resident(shape):
        # Whole-array block, same block every grid step -> stays in VMEM.
        return pl.BlockSpec(shape, lambda i: (0, 0))

    in_specs = [
        pl.BlockSpec((bb, IN_FEATURES), lambda i: (i, 0)),            # x tile
        resident((IN_FEATURES, HIDDEN)), resident((1, HIDDEN)),       # layer 1
        resident((HIDDEN, HIDDEN)),      resident((1, HIDDEN)),       # layer 2
        resident((HIDDEN, HIDDEN)),      resident((1, HIDDEN)),       # layer 3
        resident((HIDDEN, HIDDEN)),      resident((1, HIDDEN)),       # layer 4
        resident((HIDDEN, n_out)),       resident((1, n_out)),        # layer 5
    ]
    out_spec = pl.BlockSpec((bb, n_out), lambda i: (i, 0))

    out = pl.pallas_call(
        _decoder_mlp_kernel,
        out_shape=jax.ShapeDtypeStruct((b_pad, n_out), jnp.float32),
        grid_spec=pltpu.PrefetchScalarGridSpec(
            num_scalar_prefetch=0,
            grid=grid,
            in_specs=in_specs,
            out_specs=out_spec,
        ),
        compiler_params=pltpu.CompilerParams(
            dimension_semantics=("parallel",),
            vmem_limit_bytes=_vmem_limit_bytes(bb),
        ),
    )(
        rx_sig,
        params["w1"], params["b1"],
        params["w2"], params["b2"],
        params["w3"], params["b3"],
        params["w4"], params["b4"],
        params["w5"], params["b5"],
    )

    if b_pad != B:
        out = out[:B]
    return out


# --------------------------------------------------------------------------
# Parameters (synthetic, deterministic) and references
# --------------------------------------------------------------------------
def init_decoder_params_f32(key):
    """f32 master parameters matching the PyTorch module shapes.
    torch.nn.Linear(in, out) stores weight [out, in]; we keep the transpose
    [in, out] so the kernel computes x @ W."""
    dims = [(IN_FEATURES, HIDDEN), (HIDDEN, HIDDEN), (HIDDEN, HIDDEN),
            (HIDDEN, HIDDEN), (HIDDEN, CONSTELLATION_ORDER)]
    params = {}
    for idx, (fan_in, fan_out) in enumerate(dims, start=1):
        key, kw, kb = jax.random.split(key, 3)
        bound = 1.0 / (fan_in ** 0.5)  # torch default init scale
        params[f"w{idx}"] = jax.random.uniform(
            kw, (fan_in, fan_out), jnp.float32, minval=-bound, maxval=bound)
        params[f"b{idx}"] = jax.random.uniform(
            kb, (1, fan_out), jnp.float32, minval=-bound, maxval=bound)
    return params


def to_kernel_params(params_f32):
    """bf16 weights for the MXU layers (2-5); everything else stays f32."""
    kp = dict(params_f32)
    for idx in (2, 3, 4, 5):
        kp[f"w{idx}"] = params_f32[f"w{idx}"].astype(jnp.bfloat16)
    return kp


def decoder_reference_mirrored(rx_sig, kparams):
    """Pure-JAX reference mirroring the kernel arithmetic exactly
    (bf16 MXU inputs, f32 accumulation) — tight correctness check."""
    x = rx_sig
    w1 = kparams["w1"]
    h = x[:, 0:1] * w1[0:1, :] + x[:, 1:2] * w1[1:2, :] + kparams["b1"]
    h = jnp.maximum(h, 0.0)
    for idx in (2, 3, 4):
        h = jnp.dot(h.astype(jnp.bfloat16), kparams[f"w{idx}"],
                    preferred_element_type=jnp.float32) + kparams[f"b{idx}"]
        h = jnp.maximum(h, 0.0)
    return jnp.dot(h.astype(jnp.bfloat16), kparams["w5"],
                   preferred_element_type=jnp.float32) + kparams["b5"]


def decoder_reference_f32(rx_sig, params_f32):
    """Pure-f32 reference of the original PyTorch Decoder (loose check that
    the bf16 MXU path stays close to full-precision semantics)."""
    h = rx_sig
    for idx in (1, 2, 3, 4):
        h = jnp.maximum(h @ params_f32[f"w{idx}"] + params_f32[f"b{idx}"], 0.0)
    return h @ params_f32["w5"] + params_f32["b5"]


# --------------------------------------------------------------------------
if __name__ == "__main__":
    key = jax.random.PRNGKey(0)
    key, k_in = jax.random.split(key)

    # rx_sig = received complex symbols as (I, Q) pairs.  Small demo batch;
    # the block-batch clamp gives grid=(4,) so both v7x cores still get work.
    batch = 512
    rx_sig = jax.random.normal(k_in, (batch, IN_FEATURES), dtype=jnp.float32)

    params_f32 = init_decoder_params_f32(key)
    kparams = to_kernel_params(params_f32)

    out = decoder_forward(rx_sig, kparams, block_batch=2048)
    out = jax.block_until_ready(out)
    assert out.shape == (batch, CONSTELLATION_ORDER)

    # Tight check vs a reference mirroring the kernel's bf16/f32 arithmetic.
    ref_mirror = decoder_reference_mirrored(rx_sig, kparams)
    assert jnp.allclose(out, ref_mirror, atol=2e-3, rtol=2e-3), \
        "mismatch vs bf16-mirrored reference"

    # Loose check vs the pure-f32 PyTorch-equivalent forward pass.
    ref_f32 = decoder_reference_f32(rx_sig, params_f32)
    assert jnp.allclose(out, ref_f32, atol=3e-2, rtol=3e-2), \
        "bf16 MXU path drifted too far from the f32 reference"

    print("KERNEL_OK")
</pallas_src>

<mosaic_0001>
module attributes {stable_mosaic.version = 11 : i64} {
  func.func @_decoder_mlp_kernel(%arg0: i32, %arg1: memref<128x2xf32, #tpu.memory_space<vmem>>, %arg2: memref<2x256xf32, #tpu.memory_space<vmem>>, %arg3: memref<1x256xf32, #tpu.memory_space<vmem>>, %arg4: memref<256x256xbf16, #tpu.memory_space<vmem>>, %arg5: memref<1x256xf32, #tpu.memory_space<vmem>>, %arg6: memref<256x256xbf16, #tpu.memory_space<vmem>>, %arg7: memref<1x256xf32, #tpu.memory_space<vmem>>, %arg8: memref<256x256xbf16, #tpu.memory_space<vmem>>, %arg9: memref<1x256xf32, #tpu.memory_space<vmem>>, %arg10: memref<256x16xbf16, #tpu.memory_space<vmem>>, %arg11: memref<1x16xf32, #tpu.memory_space<vmem>>, %arg12: memref<128x16xf32, #tpu.memory_space<vmem>>) attributes {dimension_semantics = [#tpu.dimension_semantics<parallel>], iteration_bounds = array<i64: 4>, scalar_prefetch = 0 : i64, scratch_operands = 0 : i64, tpu.core_type = #tpu.core_type<tc>, window_params = [{transform_indices = @transform_0, window_bounds = array<i64: 128, 2>}, {pipeline_mode = #tpu.pipeline_mode<synchronous>, transform_indices = @transform_1, window_bounds = array<i64: 2, 256>}, {pipeline_mode = #tpu.pipeline_mode<synchronous>, transform_indices = @transform_2, window_bounds = array<i64: 1, 256>}, {pipeline_mode = #tpu.pipeline_mode<synchronous>, transform_indices = @transform_3, window_bounds = array<i64: 256, 256>}, {pipeline_mode = #tpu.pipeline_mode<synchronous>, transform_indices = @transform_4, window_bounds = array<i64: 1, 256>}, {pipeline_mode = #tpu.pipeline_mode<synchronous>, transform_indices = @transform_5, window_bounds = array<i64: 256, 256>}, {pipeline_mode = #tpu.pipeline_mode<synchronous>, transform_indices = @transform_6, window_bounds = array<i64: 1, 256>}, {pipeline_mode = #tpu.pipeline_mode<synchronous>, transform_indices = @transform_7, window_bounds = array<i64: 256, 256>}, {pipeline_mode = #tpu.pipeline_mode<synchronous>, transform_indices = @transform_8, window_bounds = array<i64: 1, 256>}, {pipeline_mode = #tpu.pipeline_mode<synchronous>, transform_indices = @transform_9, window_bounds = array<i64: 256, 16>}, {pipeline_mode = #tpu.pipeline_mode<synchronous>, transform_indices = @transform_10, window_bounds = array<i64: 1, 16>}, {transform_indices = @transform_11, window_bounds = array<i64: 128, 16>}]} {
    %c0 = arith.constant 0 : index
    %c0_0 = arith.constant 0 : index
    %0 = vector.load %arg1[%c0, %c0_0] : memref<128x2xf32, #tpu.memory_space<vmem>>, vector<128x2xf32>
    %c0_1 = arith.constant 0 : index
    %c0_2 = arith.constant 0 : index
    %1 = vector.load %arg2[%c0_1, %c0_2] : memref<2x256xf32, #tpu.memory_space<vmem>>, vector<2x256xf32>
    %2 = vector.extract_strided_slice %0 {offsets = [0, 0], sizes = [128, 1], strides = [1, 1]} : vector<128x2xf32> to vector<128x1xf32>
    %3 = vector.extract_strided_slice %1 {offsets = [0, 0], sizes = [1, 256], strides = [1, 1]} : vector<2x256xf32> to vector<1x256xf32>
    %4 = vector.broadcast %2 : vector<128x1xf32> to vector<128x256xf32>
    %5 = vector.broadcast %3 : vector<1x256xf32> to vector<128x256xf32>
    %6 = arith.mulf %4, %5 : vector<128x256xf32>
    %7 = vector.extract_strided_slice %0 {offsets = [0, 1], sizes = [128, 1], strides = [1, 1]} : vector<128x2xf32> to vector<128x1xf32>
    %8 = vector.extract_strided_slice %1 {offsets = [1, 0], sizes = [1, 256], strides = [1, 1]} : vector<2x256xf32> to vector<1x256xf32>
    %9 = vector.broadcast %7 : vector<128x1xf32> to vector<128x256xf32>
    %10 = vector.broadcast %8 : vector<1x256xf32> to vector<128x256xf32>
    %11 = arith.mulf %9, %10 : vector<128x256xf32>
    %12 = arith.addf %6, %11 : vector<128x256xf32>
    %c0_3 = arith.constant 0 : index
    %c0_4 = arith.constant 0 : index
    %13 = vector.load %arg3[%c0_3, %c0_4] : memref<1x256xf32, #tpu.memory_space<vmem>>, vector<1x256xf32>
    %14 = vector.broadcast %13 : vector<1x256xf32> to vector<128x256xf32>
    %15 = arith.addf %12, %14 : vector<128x256xf32>
    %cst = arith.constant 0.000000e+00 : f32
    %16 = vector.broadcast %cst : f32 to vector<128x256xf32>
    %17 = arith.maximumf %15, %16 : vector<128x256xf32>
    %18 = arith.truncf %17 : vector<128x256xf32> to vector<128x256xbf16>
    %c0_5 = arith.constant 0 : index
    %c0_6 = arith.constant 0 : index
    %19 = vector.load %arg4[%c0_5, %c0_6] : memref<256x256xbf16, #tpu.memory_space<vmem>>, vector<256x256xbf16>
    %cst_7 = arith.constant dense<0.000000e+00> : vector<128x256xf32>
    %20 = tpu.matmul %18, %19, %cst_7 {dimension_numbers = #tpu.dot_dimension_numbers<[1], [0], [0], [1], [0, 0, 1, 1], [], []>} : vector<128x256xbf16>, vector<256x256xbf16>, vector<128x256xf32> -> vector<128x256xf32>
    %c0_8 = arith.constant 0 : index
    %c0_9 = arith.constant 0 : index
    %21 = vector.load %arg5[%c0_8, %c0_9] : memref<1x256xf32, #tpu.memory_space<vmem>>, vector<1x256xf32>
    %22 = vector.broadcast %21 : vector<1x256xf32> to vector<128x256xf32>
    %23 = arith.addf %20, %22 : vector<128x256xf32>
    %cst_10 = arith.constant 0.000000e+00 : f32
    %24 = vector.broadcast %cst_10 : f32 to vector<128x256xf32>
    %25 = arith.maximumf %23, %24 : vector<128x256xf32>
    %26 = arith.truncf %25 : vector<128x256xf32> to vector<128x256xbf16>
    %c0_11 = arith.constant 0 : index
    %c0_12 = arith.constant 0 : index
    %27 = vector.load %arg6[%c0_11, %c0_12] : memref<256x256xbf16, #tpu.memory_space<vmem>>, vector<256x256xbf16>
    %cst_13 = arith.constant dense<0.000000e+00> : vector<128x256xf32>
    %28 = tpu.matmul %26, %27, %cst_13 {dimension_numbers = #tpu.dot_dimension_numbers<[1], [0], [0], [1], [0, 0, 1, 1], [], []>} : vector<128x256xbf16>, vector<256x256xbf16>, vector<128x256xf32> -> vector<128x256xf32>
    %c0_14 = arith.constant 0 : index
    %c0_15 = arith.constant 0 : index
    %29 = vector.load %arg7[%c0_14, %c0_15] : memref<1x256xf32, #tpu.memory_space<vmem>>, vector<1x256xf32>
    %30 = vector.broadcast %29 : vector<1x256xf32> to vector<128x256xf32>
    %31 = arith.addf %28, %30 : vector<128x256xf32>
    %cst_16 = arith.constant 0.000000e+00 : f32
    %32 = vector.broadcast %cst_16 : f32 to vector<128x256xf32>
    %33 = arith.maximumf %31, %32 : vector<128x256xf32>
    %34 = arith.truncf %33 : vector<128x256xf32> to vector<128x256xbf16>
    %c0_17 = arith.constant 0 : index
    %c0_18 = arith.constant 0 : index
    %35 = vector.load %arg8[%c0_17, %c0_18] : memref<256x256xbf16, #tpu.memory_space<vmem>>, vector<256x256xbf16>
    %cst_19 = arith.constant dense<0.000000e+00> : vector<128x256xf32>
    %36 = tpu.matmul %34, %35, %cst_19 {dimension_numbers = #tpu.dot_dimension_numbers<[1], [0], [0], [1], [0, 0, 1, 1], [], []>} : vector<128x256xbf16>, vector<256x256xbf16>, vector<128x256xf32> -> vector<128x256xf32>
    %c0_20 = arith.constant 0 : index
    %c0_21 = arith.constant 0 : index
    %37 = vector.load %arg9[%c0_20, %c0_21] : memref<1x256xf32, #tpu.memory_space<vmem>>, vector<1x256xf32>
    %38 = vector.broadcast %37 : vector<1x256xf32> to vector<128x256xf32>
    %39 = arith.addf %36, %38 : vector<128x256xf32>
    %cst_22 = arith.constant 0.000000e+00 : f32
    %40 = vector.broadcast %cst_22 : f32 to vector<128x256xf32>
    %41 = arith.maximumf %39, %40 : vector<128x256xf32>
    %42 = arith.truncf %41 : vector<128x256xf32> to vector<128x256xbf16>
    %c0_23 = arith.constant 0 : index
    %c0_24 = arith.constant 0 : index
    %43 = vector.load %arg10[%c0_23, %c0_24] : memref<256x16xbf16, #tpu.memory_space<vmem>>, vector<256x16xbf16>
    %cst_25 = arith.constant dense<0.000000e+00> : vector<128x16xf32>
    %44 = tpu.matmul %42, %43, %cst_25 {dimension_numbers = #tpu.dot_dimension_numbers<[1], [0], [0], [1], [0, 0, 1, 1], [], []>} : vector<128x256xbf16>, vector<256x16xbf16>, vector<128x16xf32> -> vector<128x16xf32>
    %c0_26 = arith.constant 0 : index
    %c0_27 = arith.constant 0 : index
    %45 = vector.load %arg11[%c0_26, %c0_27] : memref<1x16xf32, #tpu.memory_space<vmem>>, vector<1x16xf32>
    %46 = vector.broadcast %45 : vector<1x16xf32> to vector<128x16xf32>
    %47 = arith.addf %44, %46 : vector<128x16xf32>
    %c0_28 = arith.constant 0 : index
    %c0_29 = arith.constant 0 : index
    %48 = vector.load %arg12[%c0_28, %c0_29] : memref<128x16xf32, #tpu.memory_space<vmem>>, vector<128x16xf32>
    tpu.vector_store %arg12[%c0_28, %c0_29], %47 {strides = array<i32>} : memref<128x16xf32, #tpu.memory_space<vmem>>, vector<128x16xf32>,
    return
  }
  func.func @transform_0(%arg0: i32) -> (i32, i32) {
    %c0_i32 = arith.constant 0 : i32
    %c0_i32_0 = arith.constant 0 : i32
    return %arg0, %c0_i32 : i32, i32
  }
  func.func @transform_1(%arg0: i32) -> (i32, i32) {
    %c0_i32 = arith.constant 0 : i32
    %c0_i32_0 = arith.constant 0 : i32
    %c0_i32_1 = arith.constant 0 : i32
    return %c0_i32, %c0_i32_0 : i32, i32
  }
  func.func @transform_2(%arg0: i32) -> (i32, i32) {
    %c0_i32 = arith.constant 0 : i32
    %c0_i32_0 = arith.constant 0 : i32
    %c0_i32_1 = arith.constant 0 : i32
    return %c0_i32, %c0_i32_0 : i32, i32
  }
  func.func @transform_3(%arg0: i32) -> (i32, i32) {
    %c0_i32 = arith.constant 0 : i32
    %c0_i32_0 = arith.constant 0 : i32
    %c0_i32_1 = arith.constant 0 : i32
    return %c0_i32, %c0_i32_0 : i32, i32
  }
  func.func @transform_4(%arg0: i32) -> (i32, i32) {
    %c0_i32 = arith.constant 0 : i32
    %c0_i32_0 = arith.constant 0 : i32
    %c0_i32_1 = arith.constant 0 : i32
    return %c0_i32, %c0_i32_0 : i32, i32
  }
  func.func @transform_5(%arg0: i32) -> (i32, i32) {
    %c0_i32 = arith.constant 0 : i32
    %c0_i32_0 = arith.constant 0 : i32
    %c0_i32_1 = arith.constant 0 : i32
    return %c0_i32, %c0_i32_0 : i32, i32
  }
  func.func @transform_6(%arg0: i32) -> (i32, i32) {
    %c0_i32 = arith.constant 0 : i32
    %c0_i32_0 = arith.constant 0 : i32
    %c0_i32_1 = arith.constant 0 : i32
    return %c0_i32, %c0_i32_0 : i32, i32
  }
  func.func @transform_7(%arg0: i32) -> (i32, i32) {
    %c0_i32 = arith.constant 0 : i32
    %c0_i32_0 = arith.constant 0 : i32
    %c0_i32_1 = arith.constant 0 : i32
    return %c0_i32, %c0_i32_0 : i32, i32
  }
  func.func @transform_8(%arg0: i32) -> (i32, i32) {
    %c0_i32 = arith.constant 0 : i32
    %c0_i32_0 = arith.constant 0 : i32
    %c0_i32_1 = arith.constant 0 : i32
    return %c0_i32, %c0_i32_0 : i32, i32
  }
  func.func @transform_9(%arg0: i32) -> (i32, i32) {
    %c0_i32 = arith.constant 0 : i32
    %c0_i32_0 = arith.constant 0 : i32
    %c0_i32_1 = arith.constant 0 : i32
    return %c0_i32, %c0_i32_0 : i32, i32
  }
  func.func @transform_10(%arg0: i32) -> (i32, i32) {
    %c0_i32 = arith.constant 0 : i32
    %c0_i32_0 = arith.constant 0 : i32
    %c0_i32_1 = arith.constant 0 : i32
    return %c0_i32, %c0_i32_0 : i32, i32
  }
  func.func @transform_11(%arg0: i32) -> (i32, i32) {
    %c0_i32 = arith.constant 0 : i32
    %c0_i32_0 = arith.constant 0 : i32
    return %arg0, %c0_i32 : i32, i32
  }
}

</mosaic_0001>

<bundles_post_ra>
// kernel: tpu_custom_call.1
= control target key start
LH: loop header
LB: loop body
LE: loop exit
PB: predicated region body
PF: predicated region fallthrough
CT: control target
= control target key end

     0   :  { %16 = vsyncpa [#allocation3], 0  ;;  %s2703_s17 = smov 0   ;;  %s3352_s0 = inlined_call_operand.vmem [shape: f32[512,2], index: 0, kind: input, shape index: {}]   ;;  %s3353_s1 = inlined_call_operand.vmem [shape: f32[2,256], index: 1, kind: input, shape index: {}]   ;;  %s3354_s2 = inlined_call_operand.vmem [shape: f32[1,256], index: 2, kind: input, shape index: {}]   ;;  %s3355_s3 = inlined_call_operand.vmem [shape: bf16[256,256], index: 3, kind: input, shape index: {}]   ;;  %s3356_s4 = inlined_call_operand.vmem [shape: f32[1,256], index: 4, kind: input, shape index: {}]   ;;  %s3357_s5 = inlined_call_operand.vmem [shape: bf16[256,256], index: 5, kind: input, shape index: {}]   ;;  %s3358_s6 = inlined_call_operand.vmem [shape: f32[1,256], index: 6, kind: input, shape index: {}]   ;;  %s3359_s7 = inlined_call_operand.hbm [shape: bf16[256,256], index: 7, kind: input, shape index: {}]   ;;  %s3360_s8 = inlined_call_operand.vmem [shape: f32[1,256], index: 8, kind: input, shape index: {}]   ;;  %s3361_s9 = inlined_call_operand.vmem [shape: bf16[256,16], index: 9, kind: input, shape index: {}]   ;;  %s3362_s10 = inlined_call_operand.vmem [shape: f32[1,16], index: 10, kind: input, shape index: {}]   ;;  %s3363_s11 = inlined_call_operand.vmem [shape: f32[512,16], index: 11, kind: output, shape index: {}]  }
   0x1 LB: > { %s2204_s18 = sadd.s32 4294967295, %s2636_s17   ;;  %p2206_p0 = scmp.ge.s32.totalorder %s2636_s17, 1  ;;  %s2636_s17 = sphi %s2703_s17, %s22_s17  }
   0x2   : > { %p289_p1 = scmp.lt.s32.totalorder %s2636_s17, 5  ;;  %s2638_s19 = smov [#allocation2]  }
   0x3   : > { %s319_s20 = sshll.u32 %s2638_s19, 4  ;;  %p2717_p3 = scmp.eq.s32.totalorder %s2204_s18, 0  ;;  %s320_s20 = int_to_ptr.vmem [resolvable:$true] %s319_s20 }
   0x4   : > { %p2711_p2 = pnand %p2206_p0, %p289_p1  ;;  %s2598_s26 = scalar_lea.hbm %s3359_s7, 4096 }
   0x5   : > { %s3368_s22 = scalar_select %p2717_p3, 1, 0 }
   0x6   : > { %s3367_s21 = scalar_select %p2711_p2, 1, 0 }
   0x7   : > { %p2398_p4 = pneg %p2711_p2  ;;  %p2599_p6 = scmp.ne.s32.totalorder %s3359_s7, %s2598_s26 }
   0x8   : > { %p2605_p10 = scmp.lt.u32.totalorder %s2598_s26, %s3359_s7 }
   0x9   : > { %p2725_p5 = pnand %p2717_p3, %p2398_p4 }
   0xb   : > { %p2600_p7 = pneg %p2725_p5 }
   0xd   : > { %p2601_p8 = pnand %p2600_p7, %p2599_p6 }
   0xf   : > { %p2602_p9 = pneg %p2601_p8 }
  0x11   : > { %p2607_p11 = pnand %p2605_p10, %p2602_p9 }
  0x13   : > { %2610 = shalt.err (!%p2607_p11)
}
  0x14   : > { %s2611_s12 = scalar_lea.vmem %s320_s20, 4096  ;;  %p2619_p1 = scmp.lt.s32.totalorder %s320_s20, %s320_s20 }
  0x15   : > { %p2612_p12 = scmp.ne.s32.totalorder %s320_s20, %s2611_s12  ;;  %p2620_p4 = scmp.lt.s32.totalorder %s2611_s12, %s2611_s12 }
  0x17   : > { %p2614_p13 = pnand %p2612_p12, %p2600_p7  ;;  %p2621_p3 = por %p2620_p4, %p2619_p1 }
  0x19   : > { %p2615_p0 = pneg %p2614_p13 }
  0x1b   : > { %p2622_p2 = pnand %p2621_p3, %p2615_p0 }
  0x1d   : > { %2625 = shalt.err (!%p2622_p2)
}
  0x1e   : > { %s2639_s13 = smov 128   ;;  %s2640_s14 = smov 8  }
  0x1f   : > { %2401 = dma.hbm_to_vmem [thread:$0]  (!%p2725_p5), %s3359_s7, 4096, %s320_s20, [#allocation3], %s2639_s13, %s2639_s13, %s2640_s14  }
  0x20   : > { %p3370_p6 = scmp.ne.s32.totalorder %s3367_s21, 0 }
  0x21   : > { %p3371_p8 = scmp.ne.s32.totalorder (!%p3370_p6), %s3368_s22, 0 }
  0x22   : > { %353 = sbr.rel (%p3370_p6) target bundleno = 1160 (0x488), region = 64 }
  0x29   : > { %2631 = dma.done.wait (%p3371_p8), [#allocation3], 4096  }
  0x2a   : > { %2633 = vsyncadd (%p3371_p8), [#allocation3], 4294963200  ;;  %s2211_s19 = sshll.u32 %s2204_s18, 4  ;;  %v2641_v0 = vmov 1   ;;  %v2642_v1 = vmov 0   ;;  %v504_v57 = vlaneseq  ;;  %vm2119_vm0 = vcmask 130048  }
  0x2b   : > { %2418 = vset.pattern.permute.xlu1 %v2641_v0  ;;  %2417 = vset.pattern.permute.xlu0 %v2642_v1  ;;  %p394_p2 = scmp.lt.s32.totalorder %s2211_s19, 63  ;;  %v2438_v4 = vld [vmem:[%s3355_s3 + $0x4] ss:$8 sps:$4 sm:$0xff]   ;;  %v2440_v6 = vld [vmem:[%s3355_s3] ss:$8 sps:$4 sm:$0xff]  }
  0x2c   : > { %996 = vmatprep.subr.bf16.mxu0 %v2438_v4  ;;  %v2441_v8 = vld [vmem:[%s3355_s3 + $0x14] ss:$8 sps:$4 sm:$0xff]   ;;  %v2443_v9 = vld [vmem:[%s3355_s3 + $0x10] ss:$8 sps:$4 sm:$0xff]   ;;  %v2444_v10 = vld [vmem:[%s3355_s3 + $0x24] ss:$8 sps:$4 sm:$0xff]  }
  0x2d   : > { %s3373_s19 = smov (!%p394_p2, %s2211_s19), 63  ;;  %997 = vmatpush1.bf16.msra.mxu0 %v2440_v6  ;;  %v2446_v11 = vld [vmem:[%s3355_s3 + $0x20] ss:$8 sps:$4 sm:$0xff]   ;;  %v2447_v12 = vld [vmem:[%s3355_s3 + $0x34] ss:$8 sps:$4 sm:$0xff]   ;;  %v505_v60 = vshrl.u32 %v504_v57, 7 }
  0x2e   : > { %s2212_s20 = sshll.u32 %s3373_s19, 3  ;;  %998 = vmatprep.subr.bf16.mxu0 %v2441_v8  ;;  %v2449_v15 = vld [vmem:[%s3355_s3 + $0x30] ss:$8 sps:$4 sm:$0xff]   ;;  %v2450_v16 = vld [vmem:[%s3355_s3 + $0x44] ss:$8 sps:$4 sm:$0xff]  }
  0x2f   : > { %s2763_s22 = scalar_lea.vmem %s3352_s0, %s2212_s20  ;;  %v2452_v18 = vld [vmem:[%s3355_s3 + $0x40] ss:$8 sps:$4 sm:$0xff]   ;;  %v2453_v19 = vld [vmem:[%s3355_s3 + $0x54] ss:$8 sps:$4 sm:$0xff]   ;;  %v2455_v20 = vld [vmem:[%s3355_s3 + $0x50] ss:$8 sps:$4 sm:$0xff]   ;;  %s3299_s25 = scalar_lea.vmem %s3363_s11, %s2212_s20 }
  0x30   : > { %v406_v2 = vld [vmem:[%s2763_s22] sm:$0xff]  ;;  %v407_v3 = vld [vmem:[%s2763_s22 + $0x8] sm:$0xff]  ;;  %v408_v5 = vld [vmem:[%s2763_s22 + $0x10] sm:$0xff]  ;;  %v2929_v63 = vsub.s32 1, %v505_v60 }
  0x31   : > { %555 = vperm.xlu1 %2418, %v406_v2   ;;  %425 = vperm.xlu0 %2417, %v406_v2   ;;  %v409_v7 = vld [vmem:[%s2763_s22 + $0x18] sm:$0xff]  ;;  %v410_v13 = vld [vmem:[%s2763_s22 + $0x20] sm:$0xff]  ;;  %v412_v14 = vld [vmem:[%s2763_s22 + $0x30] sm:$0xff]  ;;  %v510_v2 = vsub.s32 2, %v505_v60 }
  0x32   : > { %999 = vmatpush1.bf16.msra.mxu0 %v2443_v9  ;;  %v411_v17 = vld [vmem:[%s2763_s22 + $0x28] sm:$0xff]  ;;  %v2459_v24 = vld [vmem:[%s3355_s3 + $0x74] ss:$8 sps:$4 sm:$0xff]   ;;  %v2461_v26 = vld [vmem:[%s3355_s3 + $0x70] ss:$8 sps:$4 sm:$0xff]  }
  0x33   : > { %1000 = vmatprep.subr.bf16.mxu0 %v2444_v10  ;;  %v2456_v21 = vld [vmem:[%s3355_s3 + $0x64] ss:$8 sps:$4 sm:$0xff]   ;;  %v2458_v23 = vld [vmem:[%s3355_s3 + $0x60] ss:$8 sps:$4 sm:$0xff]   ;;  %v413_v25 = vld [vmem:[%s2763_s22 + $0x38] sm:$0xff] }
  0x34   : > { %v415_v22 = vld [vmem:[%s2763_s22 + $0x48] sm:$0xff]  ;;  %v416_v27 = vld [vmem:[%s2763_s22 + $0x50] sm:$0xff]  ;;  %v414_v32 = vld [vmem:[%s2763_s22 + $0x40] sm:$0xff] }
  0x35   : > { %559 = vperm.xlu1 %2418, %v407_v3   ;;  %430 = vperm.xlu0 %2417, %v407_v3   ;;  %v2462_v28 = vld [vmem:[%s3355_s3 + $0x84] ss:$8 sps:$4 sm:$0xff]   ;;  %v2464_v29 = vld [vmem:[%s3355_s3 + $0x80] ss:$8 sps:$4 sm:$0xff]   ;;  %v2465_v30 = vld [vmem:[%s3355_s3 + $0x94] ss:$8 sps:$4 sm:$0xff]  }
  0x36   : > { %1001 = vmatpush1.bf16.msra.mxu0 %v2446_v11  ;;  %v2467_v31 = vld [vmem:[%s3355_s3 + $0x90] ss:$8 sps:$4 sm:$0xff]   ;;  %v2468_v33 = vld [vmem:[%s3355_s3 + $0xa4] ss:$8 sps:$4 sm:$0xff]   ;;  %v2470_v35 = vld [vmem:[%s3355_s3 + $0xa0] ss:$8 sps:$4 sm:$0xff]  }
  0x37   : > { %1002 = vmatprep.subr.bf16.mxu0 %v2447_v12  ;;  %v419_v34 = vld [vmem:[%s2763_s22 + $0x68] sm:$0xff]  ;;  %v420_v36 = vld [vmem:[%s2763_s22 + $0x70] sm:$0xff]  ;;  %v417_v42 = vld [vmem:[%s2763_s22 + $0x58] sm:$0xff] }
  0x38   : > { %v2471_v37 = vld [vmem:[%s3355_s3 + $0xb4] ss:$8 sps:$4 sm:$0xff]   ;;  %v2473_v38 = vld [vmem:[%s3355_s3 + $0xb0] ss:$8 sps:$4 sm:$0xff]   ;;  %v2474_v39 = vld [vmem:[%s3355_s3 + $0xc4] ss:$8 sps:$4 sm:$0xff]  }
  0x39   : > { %2419 = vset.pattern.permute.xlu1 %v2642_v1  ;;  %435 = vperm.xlu0 %2417, %v408_v5   ;;  %v2476_v40 = vld [vmem:[%s3355_s3 + $0xc0] ss:$8 sps:$4 sm:$0xff]   ;;  %v2477_v41 = vld [vmem:[%s3355_s3 + $0xd4] ss:$8 sps:$4 sm:$0xff]   ;;  %v2479_v43 = vld [vmem:[%s3355_s3 + $0xd0] ss:$8 sps:$4 sm:$0xff]  }
  0x3a   : > { %440 = vperm.xlu1 %2419, %v409_v7   ;;  %1003 = vmatpush1.bf16.msra.mxu0 %v2449_v15  ;;  %v2480_v44 = vld [vmem:[%s3355_s3 + $0xe4] ss:$8 sps:$4 sm:$0xff]   ;;  %v2482_v45 = vld [vmem:[%s3355_s3 + $0xe0] ss:$8 sps:$4 sm:$0xff]   ;;  %v2483_v46 = vld [vmem:[%s3355_s3 + $0xf4] ss:$8 sps:$4 sm:$0xff]  }
  0x3b   : > { %1004 = vmatprep.subr.bf16.mxu0 %v2450_v16  ;;  %v2485_v47 = vld [vmem:[%s3355_s3 + $0xf0] ss:$8 sps:$4 sm:$0xff]   ;;  %v418_v48 = vld [vmem:[%s2763_s22 + $0x60] sm:$0xff]  ;;  %v2489_v52 = vld [vmem:[%s3357_s5 + $0x14] ss:$8 sps:$4 sm:$0xff]  }
  0x3c   : > { %v421_v49 = vld [vmem:[%s2763_s22 + $0x78] sm:$0xff]  ;;  %v2486_v50 = vld [vmem:[%s3357_s5 + $0x4] ss:$8 sps:$4 sm:$0xff]   ;;  %v2488_v51 = vld [vmem:[%s3357_s5] ss:$8 sps:$4 sm:$0xff]  }
  0x3d   : > { %2420 = vset.pattern.permute.xlu0 %v2641_v0  ;;  %1361 = vmatprep.subr.bf16.mxu1 %v2486_v50  ;;  %v2491_v53 = vld [vmem:[%s3357_s5 + $0x10] ss:$8 sps:$4 sm:$0xff]   ;;  %v2492_v54 = vld [vmem:[%s3357_s5 + $0x24] ss:$8 sps:$4 sm:$0xff]   ;;  %v2494_v55 = vld [vmem:[%s3357_s5 + $0x20] ss:$8 sps:$4 sm:$0xff]  }
  0x3e   : > { %2421 = vset.pattern.permute.xlu1 %v2641_v0  ;;  %563 = vperm.xlu0 %2420, %v408_v5   ;;  %v2495_v56 = vld [vmem:[%s3357_s5 + $0x34] ss:$8 sps:$4 sm:$0xff]   ;;  %v2497_v58 = vld [vmem:[%s3357_s5 + $0x30] ss:$8 sps:$4 sm:$0xff]   ;;  %v2498_v59 = vld [vmem:[%s3357_s5 + $0x44] ss:$8 sps:$4 sm:$0xff]  }
  0x3f   : > { %567 = vperm.xlu1 %2421, %v409_v7   ;;  %1005 = vmatpush1.bf16.msra.mxu0 %v2452_v18  ;;  %v2500_v61 = vld [vmem:[%s3357_s5 + $0x40] ss:$8 sps:$4 sm:$0xff]   ;;  %v2501_v62 = vld [vmem:[%s3357_s5 + $0x54] ss:$8 sps:$4 sm:$0xff]   ;;  %v2503_v3 = vld [vmem:[%s3357_s5 + $0x50] ss:$8 sps:$4 sm:$0xff]  }
  0x40   : > { %1006 = vmatprep.subr.bf16.mxu0 %v2453_v19  ;;  %1362 = vmatpush1.bf16.msra.mxu1 %v2488_v51  ;;  %v422_v4 = vld [vmem:[%s3353_s1] sm:$0xf]  ;;  %v2504_v5 = vld [vmem:[%s3357_s5 + $0x64] ss:$8 sps:$4 sm:$0xff]   ;;  %v2507_v11 = vld [vmem:[%s3357_s5 + $0x74] ss:$8 sps:$4 sm:$0xff]  }
  0x41   : > { %1363 = vmatprep.subr.bf16.mxu1 %v2489_v52  ;;  %v621_v6 = vrot.slane %v422_v4, %v2929_v63  ;;  %v511_v9 = vrot.slane %v422_v4, %v510_v2  ;;  %v2506_v10 = vld [vmem:[%s3357_s5 + $0x60] ss:$8 sps:$4 sm:$0xff]   ;;  %v2509_v16 = vld [vmem:[%s3357_s5 + $0x70] ss:$8 sps:$4 sm:$0xff]  }
  0x42   : > { %579 = vperm.xlu0 %2420, %v412_v14   ;;  %v700_v19 = vld [vmem:[%s3354_s2] sm:$0x3]  ;;  %v2521_v57 = vld [vmem:[%s3357_s5 + $0xb0] ss:$8 sps:$4 sm:$0xff]  }
  0x43   : > { %2422 = vset.pattern.permute.xlu1 %v2642_v1  ;;  %1007 = vmatpush1.bf16.msra.mxu0 %v2455_v20  ;;  %v2951_v12 = vrot.slane %v621_v6, %v2929_v63 }
  0x44   : > { %445 = vperm.xlu1 %2422, %v410_v13   ;;  %1008 = vmatprep.subr.bf16.mxu0 %v2456_v21 }
  0x45   : > { %1364 = vmatpush1.bf16.msra.mxu1 %v2491_v53 }
  0x46   : > { %2425 = vset.pattern.permute.xlu0 %v2642_v1  ;;  %1365 = vmatprep.subr.bf16.mxu1 %v2492_v54 }
  0x47   : > { %450 = vperm.xlu0 %2425, %v411_v17   ;;  %1009 = vmatpush1.bf16.msra.mxu0 %v2458_v23 }
  0x48   : > { %2423 = vset.pattern.permute.xlu1 %v2641_v0  ;;  %1010 = vmatprep.subr.bf16.mxu0 %v2459_v24 }
  0x49   : > { %571 = vperm.xlu1 %2423, %v410_v13   ;;  %1366 = vmatpush1.bf16.msra.mxu1 %v2494_v55 }
  0x4a   : > { %1367 = vmatprep.subr.bf16.mxu1 %v2495_v56 }
  0x4b   : > { %455 = vperm.xlu0 %2425, %v412_v14   ;;  %1011 = vmatpush1.bf16.msra.mxu0 %v2461_v26  ;;  %v2513_v26 = vld [vmem:[%s3357_s5 + $0x94] ss:$8 sps:$4 sm:$0xff]  }
  0x4c   : > { %1012 = vmatprep.subr.bf16.mxu0 %v2462_v28 }
  0x4d   : > { %575 = vperm.xlu1 %2423, %v411_v17   ;;  %1368 = vmatpush1.bf16.msra.mxu1 %v2497_v58  ;;  %v2510_v17 = vld [vmem:[%s3357_s5 + $0x84] ss:$8 sps:$4 sm:$0xff]  }
  0x4e   : > { %1369 = vmatprep.subr.bf16.mxu1 %v2498_v59 }
  0x4f   : > { %470 = vperm.xlu0 %2425, %v415_v22   ;;  %1013 = vmatpush1.bf16.msra.mxu0 %v2464_v29 }
  0x50   : > { %1014 = vmatprep.subr.bf16.mxu0 %v2465_v30 }
  0x51   : > { %2424 = vset.pattern.permute.xlu1 %v2642_v1  ;;  %1370 = vmatpush1.bf16.msra.mxu1 %v2500_v61 }
  0x52   : > { %460 = vperm.xlu1 %2424, %v413_v25   ;;  %1371 = vmatprep.subr.bf16.mxu1 %v2501_v62  ;;  %v2522_v62 = vld [vmem:[%s3357_s5 + $0xc4] ss:$8 sps:$4 sm:$0xff]  }
  0x53   : > { %2430 = vset.pattern.permute.xlu0 %v2641_v0  ;;  %1015 = vmatpush1.bf16.msra.mxu0 %v2467_v31 }
  0x54   : > { %595 = vperm.xlu0 %2430, %v416_v27   ;;  %1016 = vmatprep.subr.bf16.mxu0 %v2468_v33 }
  0x55   : > { %1372 = vmatpush1.bf16.msra.mxu1 %v2503_v3 }
  0x56   : > { %2426 = vset.pattern.permute.xlu1 %v2641_v0  ;;  %1373 = vmatprep.subr.bf16.mxu1 %v2504_v5 }
  0x57   : > { %583 = vperm.xlu1 %2426, %v413_v25   ;;  %1017 = vmatpush1.bf16.msra.mxu0 %v2470_v35  ;;  %v2512_v25 = vld [vmem:[%s3357_s5 + $0x80] ss:$8 sps:$4 sm:$0xff]  }
  0x58   : > { %2431 = vset.pattern.permute.xlu0 %v2642_v1  ;;  %1018 = vmatprep.subr.bf16.mxu0 %v2471_v37 }
  0x59   : > { %475 = vperm.xlu0 %2431, %v416_v27   ;;  %1374 = vmatpush1.bf16.msra.mxu1 %v2506_v10  ;;  %v2524_v10 = vld [vmem:[%s3357_s5 + $0xc0] ss:$8 sps:$4 sm:$0xff]  }
  0x5a   : > { %1375 = vmatprep.subr.bf16.mxu1 %v2507_v11 }
  0x5b   : > { %2427 = vset.pattern.permute.xlu1 %v2642_v1  ;;  %1019 = vmatpush1.bf16.msra.mxu0 %v2473_v38  ;;  %v2516_v38 = vld [vmem:[%s3357_s5 + $0xa4] ss:$8 sps:$4 sm:$0xff]  }
  0x5c   : > { %465 = vperm.xlu1 %2427, %v414_v32   ;;  %1020 = vmatprep.subr.bf16.mxu0 %v2474_v39 }
  0x5d   : > { %490 = vperm.xlu0 %2431, %v419_v34   ;;  %1376 = vmatpush1.bf16.msra.mxu1 %v2509_v16 }
  0x5e   : > { %1377 = vmatprep.subr.bf16.mxu1 %v2510_v17  ;;  %v2525_v17 = vld [vmem:[%s3357_s5 + $0xd4] ss:$8 sps:$4 sm:$0xff]  }
  0x5f   : > { %1021 = vmatpush1.bf16.msra.mxu0 %v2476_v40 }
  0x60   : > { %2428 = vset.pattern.permute.xlu1 %v2641_v0  ;;  %1022 = vmatprep.subr.bf16.mxu0 %v2477_v41 }
  0x61   : > { %587 = vperm.xlu1 %2428, %v414_v32   ;;  %495 = vperm.xlu0 %2431, %v420_v36   ;;  %v2985_v32 = vrot.slane %v700_v19, %v2929_v63 }
  0x62   : > { %1378 = vmatpush1.bf16.msra.mxu1 %v2512_v25 }
  0x63   : > { %1023 = vmatpush1.bf16.msra.mxu0 %v2479_v43  ;;  %1379 = vmatprep.subr.bf16.mxu1 %v2513_v26 }
  0x64   : > { %1024 = vmatprep.subr.bf16.mxu0 %v2480_v44 }
  0x65   : > { %591 = vperm.xlu1 %2428, %v415_v22   ;;  %2436 = vset.pattern.permute.xlu0 %v2641_v0 }
  0x66   : > { %611 = vperm.xlu0 %2436, %v420_v36   ;;  %v2515_v36 = vld [vmem:[%s3357_s5 + $0x90] ss:$8 sps:$4 sm:$0xff]  }
  0x67   : > { %1025 = vmatpush1.bf16.msra.mxu0 %v2482_v45  ;;  %1380 = vmatpush1.bf16.msra.mxu1 %v2515_v36 }
  0x68   : > { %1026 = vmatprep.subr.bf16.mxu0 %v2483_v46  ;;  %v2518_v46 = vld [vmem:[%s3357_s5 + $0xa0] ss:$8 sps:$4 sm:$0xff]   ;;  %1381 = vmatprep.subr.bf16.mxu1 %v2516_v38 }
  0x69   : > { %2429 = vset.pattern.permute.xlu1 %v2642_v1 }
  0x6a   : > { %480 = vperm.xlu1 %2429, %v417_v42  }
  0x6b   : > { %1027 = vmatpush1.bf16.msra.mxu0 %v2485_v47  ;;  %1382 = vmatpush1.bf16.msra.mxu1 %v2518_v46 }
  0x6e   : > { %2432 = vset.pattern.permute.xlu1 %v2641_v0 }
  0x6f   : > { %599 = vperm.xlu1 %2432, %v417_v42  }
  0x73   : > { %2433 = vset.pattern.permute.xlu1 %v2642_v1 }
  0x74   : > { %485 = vperm.xlu1 %2433, %v418_v48  }
  0x78   : > { %2434 = vset.pattern.permute.xlu1 %v2641_v0 }
  0x79   : > { %603 = vperm.xlu1 %2434, %v418_v48   ;;  %v2519_v48 = vld [vmem:[%s3357_s5 + $0xb4] ss:$8 sps:$4 sm:$0xff]  }
  0x7a   : > { %1383 = vmatprep.subr.bf16.mxu1 %v2519_v48 }
  0x7b   : > { %1384 = vmatpush1.bf16.msra.mxu1 %v2521_v57 }
  0x7c   : > { %1385 = vmatprep.subr.bf16.mxu1 %v2522_v62 }
  0x7d   : > { %607 = vperm.xlu1 %2434, %v419_v34  }
  0x7f   : > { %1386 = vmatpush1.bf16.msra.mxu1 %v2524_v10 }
  0x80   : > { %1387 = vmatprep.subr.bf16.mxu1 %v2525_v17 }
  0x81   : > { %2435 = vset.pattern.permute.xlu1 %v2642_v1  ;;  %v2931_v1 = vsub.s32 0, %v505_v60 }
  0x82   : > { %500 = vperm.xlu1 %2435, %v421_v49  }
  0x83   : > { %v507_v8 = vrot.slane %v422_v4, %v2931_v1  ;;  %v2960_v15 = vrot.slane %v511_v9, %v2931_v1  ;;  %v2982_v27 = vrot.slane %v700_v19, %v2931_v1 }
  0x85   : > { %v2957_v14 = vrot.slane %v507_v8, %v2931_v1 }
  0x86   : > { %2437 = vset.pattern.permute.xlu1 %v2641_v0  ;;  %v624_v0 = vsub.s32 3, %v505_v60 }
  0x87   : > { %615 = vperm.xlu1 %2437, %v421_v49  }
  0x88   : > { %v625_v7 = vrot.slane %v422_v4, %v624_v0 }
  0x8a   : > { %v2954_v13 = vrot.slane %v625_v7, %v2929_v63 }
  0xb0   : > { %v556_v18 = vpop.permute.xlu1 %555  ;;  %v426_v20 = vpop.permute.xlu0 %425 }
  0xb1   : > { %v636_v21 = vmul.f32 %v2951_v12, %v556_v18  ;;  %v637_v22 = vmul.f32 %v2954_v13, %v556_v18  ;;  %v522_v23 = vmul.f32 %v2957_v14, %v426_v20  ;;  %v523_v24 = vmul.f32 %v2960_v15, %v426_v20 }
  0xb3   : > { %v668_v28 = vadd.f32 %v636_v21, %v522_v23  ;;  %v669_v29 = vadd.f32 %v637_v22, %v523_v24 }
  0xb4   : > { %v560_v30 = vpop.permute.xlu1 %559  ;;  %v431_v31 = vpop.permute.xlu0 %430 }
  0xb5   : > { %v638_v33 = vmul.f32 %v2951_v12, %v560_v30  ;;  %v639_v34 = vmul.f32 %v2954_v13, %v560_v30  ;;  %v524_v35 = vmul.f32 %v2957_v14, %v431_v31  ;;  %v525_v37 = vmul.f32 %v2960_v15, %v431_v31 }
  0xb6   : > { %v712_v39 = vadd.f32 %v2982_v27, %v668_v28  ;;  %v713_v43 = vadd.f32 %v2985_v32, %v669_v29 }
  0xb7   : > { %v670_v40 = vadd.f32 %v638_v33, %v524_v35  ;;  %v671_v41 = vadd.f32 %v639_v34, %v525_v37 }
  0xb8   : > { %v436_v42 = vpop.permute.xlu0 %435  ;;  %v744_v49 = vmax.f32 %v712_v39, 0.0  ;;  %v745_v53 = vmax.f32 %v713_v43, 0.0 }
  0xb9   : > { %v714_v44 = vadd.f32 %v2982_v27, %v670_v40  ;;  %v441_v45 = vpop.permute.xlu1 %440  ;;  %v715_v47 = vadd.f32 %v2985_v32, %v671_v41  ;;  %v526_v51 = vmul.f32 %v2957_v14, %v436_v42  ;;  %v527_v52 = vmul.f32 %v2960_v15, %v436_v42 }
  0xba   : > { %v528_v0 = vmul.f32 %v2957_v14, %v441_v45  ;;  %v529_v2 = vmul.f32 %v2960_v15, %v441_v45 }
  0xbb   : > { %v746_v50 = vmax.f32 %v714_v44, 0.0  ;;  %v747_v54 = vmax.f32 %v715_v47, 0.0 }
  0xbd   : > { %v564_v55 = vpop.permute.xlu0 %563  ;;  %v776_v56 = vpack.c.bf16 %v746_v50, %v744_v49  ;;  %v777_v61 = vpack.c.bf16 %v747_v54, %v745_v53 }
  0xbe   : > { %v568_v58 = vpop.permute.xlu1 %567  ;;  %v640_v59 = vmul.f32 %v2951_v12, %v564_v55  ;;  %v641_v60 = vmul.f32 %v2954_v13, %v564_v55 }
  0xbf   : > { %v642_v3 = vmul.f32 %v2951_v12, %v568_v58  ;;  %v643_v4 = vmul.f32 %v2954_v13, %v568_v58  ;;  %1028 = vmatprep.mubr.bf16.mxu0 %v777_v61 }
  0xc0   : > { %v672_v5 = vadd.f32 %v640_v59, %v526_v51  ;;  %v673_v6 = vadd.f32 %v641_v60, %v527_v52  ;;  %1029 = vmatmul.mubr.bf16.vlgmr.msra.gmra.mrb[0].mxu0 %v776_v56 }
  0xc1   : > { %v674_v7 = vadd.f32 %v642_v3, %v528_v0  ;;  %v675_v8 = vadd.f32 %v643_v4, %v529_v2  ;;  %v580_v9 = vpop.permute.xlu0 %579 }
  0xc2   : > { %v716_v11 = vadd.f32 %v2982_v27, %v672_v5  ;;  %v717_v16 = vadd.f32 %v2985_v32, %v673_v6  ;;  %v648_v43 = vmul.f32 %v2951_v12, %v580_v9  ;;  %v649_v44 = vmul.f32 %v2954_v13, %v580_v9 }
  0xc3   : > { %v718_v18 = vadd.f32 %v2982_v27, %v674_v7  ;;  %v719_v19 = vadd.f32 %v2985_v32, %v675_v8  ;;  %v446_v20 = vpop.permute.xlu1 %445 }
  0xc4   : > { %v749_v21 = vmax.f32 %v717_v16, 0.0  ;;  %v748_v22 = vmax.f32 %v716_v11, 0.0  ;;  %v530_v30 = vmul.f32 %v2957_v14, %v446_v20  ;;  %v531_v31 = vmul.f32 %v2960_v15, %v446_v20 }
  0xc5   : > { %v751_v23 = vmax.f32 %v719_v19, 0.0  ;;  %v750_v24 = vmax.f32 %v718_v18, 0.0 }
  0xc6   : > { %v451_v28 = vpop.permute.xlu0 %450 }
  0xc7   : > { %v779_v25 = vpack.c.bf16 %v751_v23, %v749_v21  ;;  %v778_v26 = vpack.c.bf16 %v750_v24, %v748_v22  ;;  %v532_v37 = vmul.f32 %v2957_v14, %v451_v28  ;;  %v533_v38 = vmul.f32 %v2960_v15, %v451_v28 }
  0xc8   : > { %v572_v29 = vpop.permute.xlu1 %571 }
  0xc9   : > { %v644_v33 = vmul.f32 %v2951_v12, %v572_v29  ;;  %v645_v34 = vmul.f32 %v2954_v13, %v572_v29  ;;  %1038 = vmatprep.mubr.bf16.mxu0 %v779_v25 }
  0xca   : > { %1039 = vmatmul.mubr.bf16.gmra.mrb[4].mxu0 %v778_v26  ;;  %v456_v39 = vpop.permute.xlu0 %455 }
  0xcb   : > { %v676_v35 = vadd.f32 %v644_v33, %v530_v30  ;;  %v677_v36 = vadd.f32 %v645_v34, %v531_v31  ;;  %v534_v45 = vmul.f32 %v2957_v14, %v456_v39  ;;  %v535_v46 = vmul.f32 %v2960_v15, %v456_v39 }
  0xcc   : > { %v576_v40 = vpop.permute.xlu1 %575 }
  0xcd   : > { %v646_v41 = vmul.f32 %v2951_v12, %v576_v40  ;;  %v647_v42 = vmul.f32 %v2954_v13, %v576_v40  ;;  %v720_v47 = vadd.f32 %v2982_v27, %v676_v35  ;;  %v721_v48 = vadd.f32 %v2985_v32, %v677_v36 }
  0xce   : > { %v680_v54 = vadd.f32 %v648_v43, %v534_v45  ;;  %v681_v55 = vadd.f32 %v649_v44, %v535_v46  ;;  %v471_v16 = vpop.permute.xlu0 %470 }
  0xcf   : > { %v678_v49 = vadd.f32 %v646_v41, %v532_v37  ;;  %v679_v50 = vadd.f32 %v647_v42, %v533_v38  ;;  %v753_v56 = vmax.f32 %v721_v48, 0.0  ;;  %v752_v58 = vmax.f32 %v720_v47, 0.0 }
  0xd0   : > { %v724_v62 = vadd.f32 %v2982_v27, %v680_v54  ;;  %v725_v0 = vadd.f32 %v2985_v32, %v681_v55  ;;  %v540_v34 = vmul.f32 %v2957_v14, %v471_v16  ;;  %v541_v35 = vmul.f32 %v2960_v15, %v471_v16 }
  0xd1   : > { %v722_v51 = vadd.f32 %v2982_v27, %v678_v49  ;;  %v723_v52 = vadd.f32 %v2985_v32, %v679_v50  ;;  %v461_v53 = vpop.permute.xlu1 %460 }
  0xd2   : > { %v536_v3 = vmul.f32 %v2957_v14, %v461_v53  ;;  %v537_v4 = vmul.f32 %v2960_v15, %v461_v53  ;;  %v757_v17 = vmax.f32 %v725_v0, 0.0  ;;  %v756_v18 = vmax.f32 %v724_v62, 0.0 }
  0xd3   : > { %v755_v57 = vmax.f32 %v723_v52, 0.0  ;;  %v754_v59 = vmax.f32 %v722_v51, 0.0  ;;  %v596_v23 = vpop.permute.xlu0 %595 }
  0xd4   : > { %v656_v39 = vmul.f32 %v2951_v12, %v596_v23  ;;  %v657_v40 = vmul.f32 %v2954_v13, %v596_v23 }
  0xd5   : > { %v781_v60 = vpack.c.bf16 %v755_v57, %v753_v56  ;;  %v780_v61 = vpack.c.bf16 %v754_v59, %v752_v58 }
  0xd6   : > { %v584_v2 = vpop.permute.xlu1 %583 }
  0xd7   : > { %v650_v5 = vmul.f32 %v2951_v12, %v584_v2  ;;  %v651_v6 = vmul.f32 %v2954_v13, %v584_v2  ;;  %1048 = vmatprep.mubr.bf16.mxu0 %v781_v60 }
  0xd8   : > { %1049 = vmatmul.mubr.bf16.gmra.mrb[8].mxu0 %v780_v61  ;;  %v476_v38 = vpop.permute.xlu0 %475 }
  0xd9   : > { %v682_v7 = vadd.f32 %v650_v5, %v536_v3  ;;  %v683_v8 = vadd.f32 %v651_v6, %v537_v4  ;;  %v542_v41 = vmul.f32 %v2957_v14, %v476_v38  ;;  %v543_v42 = vmul.f32 %v2960_v15, %v476_v38 }
  0xdb   : > { %v726_v9 = vadd.f32 %v2982_v27, %v682_v7  ;;  %v727_v10 = vadd.f32 %v2985_v32, %v683_v8  ;;  %v466_v11 = vpop.permute.xlu1 %465  ;;  %v688_v50 = vadd.f32 %v656_v39, %v542_v41  ;;  %v689_v51 = vadd.f32 %v657_v40, %v543_v42 }
  0xdc   : > { %v538_v25 = vmul.f32 %v2957_v14, %v466_v11  ;;  %v539_v26 = vmul.f32 %v2960_v15, %v466_v11  ;;  %v491_v5 = vpop.permute.xlu0 %490 }
  0xdd   : > { %v759_v19 = vmax.f32 %v727_v10, 0.0  ;;  %v758_v20 = vmax.f32 %v726_v9, 0.0  ;;  %v732_v58 = vadd.f32 %v2982_v27, %v688_v50  ;;  %v733_v59 = vadd.f32 %v2985_v32, %v689_v51 }
  0xdf   : > { %v783_v21 = vpack.c.bf16 %v759_v19, %v757_v17  ;;  %v782_v22 = vpack.c.bf16 %v758_v20, %v756_v18  ;;  %v765_v9 = vmax.f32 %v733_v59, 0.0  ;;  %v764_v10 = vmax.f32 %v732_v58, 0.0 }
  0xe0   : > { %v588_v24 = vpop.permute.xlu1 %587  ;;  %v496_v19 = vpop.permute.xlu0 %495 }
  0xe1   : > { %v652_v28 = vmul.f32 %v2951_v12, %v588_v24  ;;  %v653_v29 = vmul.f32 %v2954_v13, %v588_v24  ;;  %1058 = vmatprep.mubr.bf16.mxu0 %v783_v21  ;;  %v550_v39 = vmul.f32 %v2957_v14, %v496_v19  ;;  %v551_v40 = vmul.f32 %v2960_v15, %v496_v19  ;;  %v2543_v19 = vld [vmem:[#allocation2 + $0x30] ss:$8 sps:$4 sm:$0xff]  }
  0xe2   : > { %1059 = vmatmul.mubr.bf16.gmra.mrb[12].mxu0 %v782_v22 }
  0xe3   : > { %v684_v30 = vadd.f32 %v652_v28, %v538_v25  ;;  %v685_v31 = vadd.f32 %v653_v29, %v539_v26  ;;  %v548_v29 = vmul.f32 %v2957_v14, %v491_v5 }
  0xe4   : > { %v592_v33 = vpop.permute.xlu1 %591 }
  0xe5   : > { %v654_v36 = vmul.f32 %v2951_v12, %v592_v33  ;;  %v655_v37 = vmul.f32 %v2954_v13, %v592_v33  ;;  %v728_v43 = vadd.f32 %v2982_v27, %v684_v30  ;;  %v729_v44 = vadd.f32 %v2985_v32, %v685_v31 }
  0xe6   : > { %v549_v30 = vmul.f32 %v2960_v15, %v491_v5 }
  0xe7   : > { %v686_v45 = vadd.f32 %v654_v36, %v540_v34  ;;  %v687_v46 = vadd.f32 %v655_v37, %v541_v35  ;;  %v761_v52 = vmax.f32 %v729_v44, 0.0  ;;  %v760_v54 = vmax.f32 %v728_v43, 0.0  ;;  %v612_v34 = vpop.permute.xlu0 %611 }
  0xe8   : > { %v664_v41 = vmul.f32 %v2951_v12, %v612_v34  ;;  %v665_v42 = vmul.f32 %v2954_v13, %v612_v34 }
  0xe9   : > { %v730_v47 = vadd.f32 %v2982_v27, %v686_v45  ;;  %v731_v48 = vadd.f32 %v2985_v32, %v687_v46  ;;  %v481_v49 = vpop.permute.xlu1 %480 }
  0xea   : > { %v544_v61 = vmul.f32 %v2957_v14, %v481_v49  ;;  %v545_v62 = vmul.f32 %v2960_v15, %v481_v49  ;;  %v696_v50 = vadd.f32 %v664_v41, %v550_v39  ;;  %v697_v51 = vadd.f32 %v665_v42, %v551_v40 }
  0xeb   : > { %v763_v53 = vmax.f32 %v731_v48, 0.0  ;;  %v762_v55 = vmax.f32 %v730_v47, 0.0 }
  0xec   : > { %v740_v59 = vadd.f32 %v2982_v27, %v696_v50 }
  0xed   : > { %v785_v56 = vpack.c.bf16 %v763_v53, %v761_v52  ;;  %v784_v57 = vpack.c.bf16 %v762_v55, %v760_v54 }
  0xee   : > { %v600_v60 = vpop.permute.xlu1 %599 }
  0xef   : > { %v658_v0 = vmul.f32 %v2951_v12, %v600_v60  ;;  %v659_v2 = vmul.f32 %v2954_v13, %v600_v60  ;;  %1068 = vmatprep.mubr.bf16.mxu0 %v785_v56  ;;  %v741_v60 = vadd.f32 %v2985_v32, %v697_v51 }
  0xf0   : > { %1069 = vmatmul.mubr.bf16.gmra.mrb[16].mxu0 %v784_v57 }
  0xf1   : > { %v690_v3 = vadd.f32 %v658_v0, %v544_v61  ;;  %v691_v4 = vadd.f32 %v659_v2, %v545_v62 }
  0xf3   : > { %v734_v6 = vadd.f32 %v2982_v27, %v690_v3  ;;  %v735_v7 = vadd.f32 %v2985_v32, %v691_v4  ;;  %v486_v8 = vpop.permute.xlu1 %485  ;;  %v772_v3 = vmax.f32 %v740_v59, 0.0 }
  0xf4   : > { %v546_v21 = vmul.f32 %v2957_v14, %v486_v8  ;;  %v547_v22 = vmul.f32 %v2960_v15, %v486_v8  ;;  %v2534_v8 = vld [vmem:[#allocation2] ss:$8 sps:$4 sm:$0xff]  }
  0xf5   : > { %v767_v11 = vmax.f32 %v735_v7, 0.0  ;;  %v766_v16 = vmax.f32 %v734_v6, 0.0  ;;  %v2528_v6 = vld [vmem:[%s3357_s5 + $0xe4] ss:$8 sps:$4 sm:$0xff]   ;;  %v2533_v7 = vld [vmem:[%s3357_s5 + $0xf0] ss:$8 sps:$4 sm:$0xff]  }
  0xf7   : > { %v787_v17 = vpack.c.bf16 %v767_v11, %v765_v9  ;;  %v786_v18 = vpack.c.bf16 %v766_v16, %v764_v10  ;;  %v2536_v9 = vld [vmem:[#allocation2 + $0x4] ss:$8 sps:$4 sm:$0xff]   ;;  %v2539_v10 = vld [vmem:[#allocation2 + $0x14] ss:$8 sps:$4 sm:$0xff]   ;;  %v2537_v11 = vld [vmem:[#allocation2 + $0x10] ss:$8 sps:$4 sm:$0xff]  }
  0xf8   : > { %v604_v20 = vpop.permute.xlu1 %603  ;;  %1726 = vmatprep.subr.bf16.mxu0 %v2536_v9  ;;  %v2542_v16 = vld [vmem:[#allocation2 + $0x24] ss:$8 sps:$4 sm:$0xff]  }
  0xf9   : > { %v660_v23 = vmul.f32 %v2951_v12, %v604_v20  ;;  %v661_v24 = vmul.f32 %v2954_v13, %v604_v20  ;;  %1078 = vmatprep.mubr.bf16.mxu0 %v787_v17  ;;  %1727 = vmatpush1.bf16.msra.mxu0 %v2534_v8  ;;  %v2540_v17 = vld [vmem:[#allocation2 + $0x20] ss:$8 sps:$4 sm:$0xff]   ;;  %v2548_v20 = vld [vmem:[#allocation2 + $0x44] ss:$8 sps:$4 sm:$0xff]  }
  0xfa   : > { %1079 = vmatmul.mubr.bf16.gmra.mrb[20].mxu0 %v786_v18  ;;  %1728 = vmatprep.subr.bf16.mxu0 %v2539_v10  ;;  %v2545_v18 = vld [vmem:[#allocation2 + $0x34] ss:$8 sps:$4 sm:$0xff]  }
  0xfb   : > { %v692_v25 = vadd.f32 %v660_v23, %v546_v21  ;;  %v693_v26 = vadd.f32 %v661_v24, %v547_v22  ;;  %v2546_v21 = vld [vmem:[#allocation2 + $0x40] ss:$8 sps:$4 sm:$0xff]   ;;  %v2551_v22 = vld [vmem:[#allocation2 + $0x54] ss:$8 sps:$4 sm:$0xff]   ;;  %v2549_v23 = vld [vmem:[#allocation2 + $0x50] ss:$8 sps:$4 sm:$0xff]  }
  0xfc   : > { %v608_v28 = vpop.permute.xlu1 %607  ;;  %v2554_v24 = vld [vmem:[#allocation2 + $0x64] ss:$8 sps:$4 sm:$0xff]  }
  0xfd   : > { %v662_v31 = vmul.f32 %v2951_v12, %v608_v28  ;;  %v663_v33 = vmul.f32 %v2954_v13, %v608_v28  ;;  %v736_v35 = vadd.f32 %v2982_v27, %v692_v25  ;;  %v737_v36 = vadd.f32 %v2985_v32, %v693_v26  ;;  %1729 = vmatpush1.bf16.msra.mxu0 %v2537_v11  ;;  %v2552_v25 = vld [vmem:[#allocation2 + $0x60] ss:$8 sps:$4 sm:$0xff]   ;;  %v2557_v26 = vld [vmem:[#allocation2 + $0x74] ss:$8 sps:$4 sm:$0xff]   ;;  %v2555_v28 = vld [vmem:[#allocation2 + $0x70] ss:$8 sps:$4 sm:$0xff]  }
  0xfe   : > { %1730 = vmatprep.subr.bf16.mxu0 %v2542_v16 }
  0xff   : > { %v694_v37 = vadd.f32 %v662_v31, %v548_v29  ;;  %v695_v38 = vadd.f32 %v663_v33, %v549_v30  ;;  %v769_v46 = vmax.f32 %v737_v36, 0.0  ;;  %v768_v48 = vmax.f32 %v736_v35, 0.0  ;;  %v2560_v29 = vld [vmem:[#allocation2 + $0x84] ss:$8 sps:$4 sm:$0xff]   ;;  %v824_v30 = vld [vmem:[%s3356_s4] sm:$0x3] }
 0x100   : > { %v2558_v31 = vld [vmem:[#allocation2 + $0x80] ss:$8 sps:$4 sm:$0xff]   ;;  %v2563_v33 = vld [vmem:[#allocation2 + $0x94] ss:$8 sps:$4 sm:$0xff]   ;;  %v3122_v34 = vrot.slane %v824_v30, %v2931_v1  ;;  %v3125_v35 = vrot.slane %v824_v30, %v2929_v63  ;;  %v2561_v36 = vld [vmem:[#allocation2 + $0x90] ss:$8 sps:$4 sm:$0xff]  }
 0x101   : > { %v738_v43 = vadd.f32 %v2982_v27, %v694_v37  ;;  %v739_v44 = vadd.f32 %v2985_v32, %v695_v38  ;;  %v501_v45 = vpop.permute.xlu1 %500  ;;  %1731 = vmatpush1.bf16.msra.mxu0 %v2540_v17  ;;  %v2566_v38 = vld [vmem:[#allocation2 + $0xa4] ss:$8 sps:$4 sm:$0xff]  }
 0x102   : > { %v552_v55 = vmul.f32 %v2957_v14, %v501_v45  ;;  %v553_v56 = vmul.f32 %v2960_v15, %v501_v45  ;;  %v773_v14 = vmax.f32 %v741_v60, 0.0  ;;  %1732 = vmatprep.subr.bf16.mxu0 %v2545_v18  ;;  %v2564_v45 = vld [vmem:[#allocation2 + $0xa0] ss:$8 sps:$4 sm:$0xff]  }
 0x103   : > { %v771_v47 = vmax.f32 %v739_v44, 0.0  ;;  %v770_v49 = vmax.f32 %v738_v43, 0.0 }
 0x105   : > { %v789_v52 = vpack.c.bf16 %v771_v47, %v769_v46  ;;  %v788_v53 = vpack.c.bf16 %v770_v49, %v768_v48  ;;  %1733 = vmatpush1.bf16.msra.mxu0 %v2543_v19  ;;  %v2569_v47 = vld [vmem:[#allocation2 + $0xb4] ss:$8 sps:$4 sm:$0xff]  }
 0x106   : > { %v616_v54 = vpop.permute.xlu1 %615  ;;  %1734 = vmatprep.subr.bf16.mxu0 %v2548_v20 }
 0x107   : > { %v666_v57 = vmul.f32 %v2951_v12, %v616_v54  ;;  %v667_v58 = vmul.f32 %v2954_v13, %v616_v54  ;;  %1088 = vmatprep.mubr.bf16.mxu0 %v789_v52  ;;  %v2527_v13 = vld [vmem:[%s3357_s5 + $0xd0] ss:$8 sps:$4 sm:$0xff]  }
 0x108   : > { %1089 = vmatmul.mubr.bf16.gmra.mrb[24].mxu0 %v788_v53  ;;  %1388 = vmatpush1.bf16.msra.mxu1 %v2527_v13  ;;  %v2567_v53 = vld [vmem:[#allocation2 + $0xb0] ss:$8 sps:$4 sm:$0xff]  }
 0x109   : > { %v698_v61 = vadd.f32 %v666_v57, %v552_v55  ;;  %v699_v62 = vadd.f32 %v667_v58, %v553_v56  ;;  %1389 = vmatprep.subr.bf16.mxu1 %v2528_v6  ;;  %1735 = vmatpush1.bf16.msra.mxu0 %v2546_v21  ;;  %v2572_v55 = vld [vmem:[#allocation2 + $0xc4] ss:$8 sps:$4 sm:$0xff]  }
 0x10a   : > { %1736 = vmatprep.subr.bf16.mxu0 %v2551_v22 }
 0x10b   : > { %v742_v0 = vadd.f32 %v2982_v27, %v698_v61  ;;  %v743_v2 = vadd.f32 %v2985_v32, %v699_v62  ;;  %v2530_v27 = vld [vmem:[%s3357_s5 + $0xe0] ss:$8 sps:$4 sm:$0xff]   ;;  %v2531_v32 = vld [vmem:[%s3357_s5 + $0xf4] ss:$8 sps:$4 sm:$0xff]  }
 0x10c   : > { %1390 = vmatpush1.bf16.msra.mxu1 %v2530_v27  ;;  %v2570_v61 = vld [vmem:[#allocation2 + $0xc0] ss:$8 sps:$4 sm:$0xff]  }
 0x10d   : > { %v774_v4 = vmax.f32 %v742_v0, 0.0  ;;  %v775_v15 = vmax.f32 %v743_v2, 0.0  ;;  %1391 = vmatprep.subr.bf16.mxu1 %v2531_v32  ;;  %1737 = vmatpush1.bf16.msra.mxu0 %v2549_v23  ;;  %v2575_v2 = vld [vmem:[#allocation2 + $0xd4] ss:$8 sps:$4 sm:$0xff]  }
 0x10e   : > { %1738 = vmatprep.subr.bf16.mxu0 %v2554_v24 }
 0x10f   : > { %v791_v5 = vpack.c.bf16 %v775_v15, %v773_v14  ;;  %v790_v12 = vpack.c.bf16 %v774_v4, %v772_v3 }
 0x110   : > { %1392 = vmatpush1.bf16.msra.mxu1 %v2533_v7 }
 0x111   : > { %1098 = vmatprep.mubr.bf16.mxu0 %v791_v5  ;;  %1739 = vmatpush1.bf16.msra.mxu0 %v2552_v25 }
 0x112   : > { %1099 = vmatmul.mubr.bf16.gmra.mrb[28].mxu0 %v790_v12  ;;  %1740 = vmatprep.subr.bf16.mxu0 %v2557_v26  ;;  %v2573_v12 = vld [vmem:[#allocation2 + $0xd0] ss:$8 sps:$4 sm:$0xff]  }
 0x115   : > { %1741 = vmatpush1.bf16.msra.mxu0 %v2555_v28 }
 0x116   : > { %1742 = vmatprep.subr.bf16.mxu0 %v2560_v29 }
 0x119   : > { %1743 = vmatpush1.bf16.msra.mxu0 %v2558_v31 }
 0x11a   : > { %1744 = vmatprep.subr.bf16.mxu0 %v2563_v33 }
 0x11d   : > { %1745 = vmatpush1.bf16.msra.mxu0 %v2561_v36 }
 0x11e   : > { %1746 = vmatprep.subr.bf16.mxu0 %v2566_v38 }
 0x121   : > { %1747 = vmatpush1.bf16.msra.mxu0 %v2564_v45 }
 0x122   : > { %1748 = vmatprep.subr.bf16.mxu0 %v2569_v47 }
 0x125   : > { %1749 = vmatpush1.bf16.msra.mxu0 %v2567_v53 }
 0x126   : > { %1750 = vmatprep.subr.bf16.mxu0 %v2572_v55 }
 0x129   : > { %1751 = vmatpush1.bf16.msra.mxu0 %v2570_v61 }
 0x12a   : > { %1752 = vmatprep.subr.bf16.mxu0 %v2575_v2 }
 0x12d   : > { %1753 = vmatpush1.bf16.msra.mxu0 %v2573_v12 }
 0x193   : > { %v1030_v37 = vpop.f32.mrb[0].mxu0 }
 0x194   : > { %v1031_v39 = vadd.f32 %v1030_v37, %v3122_v34  ;;  %v1032_v40 = vpop.f32.mrb[1].mxu0 }
 0x195   : > { %v1033_v41 = vadd.f32 %v1032_v40, %v3125_v35  ;;  %v1034_v42 = vpop.f32.mrb[2].mxu0 }
 0x196   : > { %v1035_v43 = vadd.f32 %v1034_v42, %v3122_v34  ;;  %v1036_v44 = vpop.f32.mrb[3].mxu0  ;;  %v1109_v48 = vmax.f32 %v1031_v39, 0.0 }
 0x197   : > { %v1037_v46 = vadd.f32 %v1036_v44, %v3125_v35  ;;  %v1110_v50 = vmax.f32 %v1033_v41, 0.0 }
 0x198   : > { %v1111_v49 = vmax.f32 %v1035_v43, 0.0 }
 0x199   : > { %v1112_v51 = vmax.f32 %v1037_v46, 0.0 }
 0x19a   : > { %v1141_v52 = vpack.c.bf16 %v1111_v49, %v1109_v48 }
 0x19b   : > { %v1142_v54 = vpack.c.bf16 %v1112_v51, %v1110_v50 }
 0x19d   : > { %v1040_v56 = vpop.f32.mrb[4].mxu0  ;;  %1393 = vmatprep.mubr.bf16.mxu1 %v1142_v54 }
 0x19e   : > { %v1041_v57 = vadd.f32 %v1040_v56, %v3122_v34  ;;  %v1042_v58 = vpop.f32.mrb[5].mxu0  ;;  %1394 = vmatmul.mubr.bf16.vlgmr.msra.gmra.mrb[0].mxu1 %v1141_v52 }
 0x19f   : > { %v1043_v59 = vadd.f32 %v1042_v58, %v3125_v35  ;;  %v1044_v60 = vpop.f32.mrb[6].mxu0 }
 0x1a0   : > { %v1045_v62 = vadd.f32 %v1044_v60, %v3122_v34  ;;  %v1046_v0 = vpop.f32.mrb[7].mxu0  ;;  %v1113_v14 = vmax.f32 %v1041_v57, 0.0 }
 0x1a1   : > { %v1047_v3 = vadd.f32 %v1046_v0, %v3125_v35  ;;  %v1114_v15 = vmax.f32 %v1043_v59, 0.0 }
 0x1a2   : > { %v1115_v4 = vmax.f32 %v1045_v62, 0.0 }
 0x1a3   : > { %v1116_v5 = vmax.f32 %v1047_v3, 0.0 }
 0x1a4   : > { %v1143_v13 = vpack.c.bf16 %v1115_v4, %v1113_v14 }
 0x1a5   : > { %v1144_v6 = vpack.c.bf16 %v1116_v5, %v1114_v15 }
 0x1a7   : > { %1403 = vmatprep.mubr.bf16.mxu1 %v1144_v6 }
 0x1a8   : > { %1404 = vmatmul.mubr.bf16.gmra.mrb[4].mxu1 %v1143_v13 }
 0x1ab   : > { %v1050_v27 = vpop.f32.mrb[8].mxu0 }
 0x1ac   : > { %v1051_v32 = vadd.f32 %v1050_v27, %v3122_v34  ;;  %v1052_v7 = vpop.f32.mrb[9].mxu0 }
 0x1ad   : > { %v1053_v8 = vadd.f32 %v1052_v7, %v3125_v35  ;;  %v1054_v9 = vpop.f32.mrb[10].mxu0 }
 0x1ae   : > { %v1055_v10 = vadd.f32 %v1054_v9, %v3122_v34  ;;  %v1056_v11 = vpop.f32.mrb[11].mxu0  ;;  %v1117_v17 = vmax.f32 %v1051_v32, 0.0 }
 0x1af   : > { %v1057_v16 = vadd.f32 %v1056_v11, %v3125_v35  ;;  %v1118_v19 = vmax.f32 %v1053_v8, 0.0 }
 0x1b0   : > { %v1119_v18 = vmax.f32 %v1055_v10, 0.0 }
 0x1b1   : > { %v1120_v20 = vmax.f32 %v1057_v16, 0.0 }
 0x1b2   : > { %v1145_v21 = vpack.c.bf16 %v1119_v18, %v1117_v17 }
 0x1b3   : > { %v1146_v22 = vpack.c.bf16 %v1120_v20, %v1118_v19 }
 0x1b5   : > { %v1060_v23 = vpop.f32.mrb[12].mxu0  ;;  %1413 = vmatprep.mubr.bf16.mxu1 %v1146_v22 }
 0x1b6   : > { %v1061_v24 = vadd.f32 %v1060_v23, %v3122_v34  ;;  %v1062_v25 = vpop.f32.mrb[13].mxu0  ;;  %1414 = vmatmul.mubr.bf16.gmra.mrb[8].mxu1 %v1145_v21 }
 0x1b7   : > { %v1063_v26 = vadd.f32 %v1062_v25, %v3125_v35  ;;  %v1064_v28 = vpop.f32.mrb[14].mxu0 }
 0x1b8   : > { %v1065_v29 = vadd.f32 %v1064_v28, %v3122_v34  ;;  %v1066_v30 = vpop.f32.mrb[15].mxu0  ;;  %v1121_v33 = vmax.f32 %v1061_v24, 0.0 }
 0x1b9   : > { %v1067_v31 = vadd.f32 %v1066_v30, %v3125_v35  ;;  %v1122_v37 = vmax.f32 %v1063_v26, 0.0 }
 0x1ba   : > { %v1123_v36 = vmax.f32 %v1065_v29, 0.0 }
 0x1bb   : > { %v1124_v38 = vmax.f32 %v1067_v31, 0.0 }
 0x1bc   : > { %v1147_v39 = vpack.c.bf16 %v1123_v36, %v1121_v33 }
 0x1bd   : > { %v1148_v40 = vpack.c.bf16 %v1124_v38, %v1122_v37  ;;  %v2578_v37 = vld [vmem:[#allocation2 + $0xe4] ss:$8 sps:$4 sm:$0xff]   ;;  %v2576_v38 = vld [vmem:[#allocation2 + $0xe0] ss:$8 sps:$4 sm:$0xff]  }
 0x1be   : > { %1754 = vmatprep.subr.bf16.mxu0 %v2578_v37 }
 0x1bf   : > { %1423 = vmatprep.mubr.bf16.mxu1 %v1148_v40  ;;  %1755 = vmatpush1.bf16.msra.mxu0 %v2576_v38  ;;  %v2579_v40 = vld [vmem:[#allocation2 + $0xf0] ss:$8 sps:$4 sm:$0xff]  }
 0x1c0   : > { %1424 = vmatmul.mubr.bf16.gmra.mrb[12].mxu1 %v1147_v39  ;;  %v2581_v39 = vld [vmem:[#allocation2 + $0xf4] ss:$8 sps:$4 sm:$0xff]  }
 0x1c1   : > { %1756 = vmatprep.subr.bf16.mxu0 %v2581_v39 }
 0x1c3   : > { %v1070_v41 = vpop.f32.mrb[16].mxu0  ;;  %1757 = vmatpush1.bf16.msra.mxu0 %v2579_v40 }
 0x1c4   : > { %v1071_v42 = vadd.f32 %v1070_v41, %v3122_v34  ;;  %v1072_v43 = vpop.f32.mrb[17].mxu0  ;;  %v2584_v41 = vld [vmem:[%s3361_s9 + $0x48] sm:$0xff]  }
 0x1c5   : > { %v1073_v44 = vadd.f32 %v1072_v43, %v3125_v35  ;;  %v1074_v45 = vpop.f32.mrb[18].mxu0  ;;  %v2586_v43 = vld [vmem:[%s3361_s9 + $0x50] sm:$0xff]  }
 0x1c6   : > { %v1075_v46 = vadd.f32 %v1074_v45, %v3122_v34  ;;  %v1076_v47 = vpop.f32.mrb[19].mxu0  ;;  %v1125_v49 = vmax.f32 %v1071_v42, 0.0  ;;  %v2585_v42 = vld [vmem:[%s3361_s9 + $0x8] sm:$0xff]   ;;  %v2588_v45 = vld [vmem:[%s3361_s9 + $0x58] sm:$0xff]  }
 0x1c7   : > { %v1077_v48 = vadd.f32 %v1076_v47, %v3125_v35  ;;  %v1126_v51 = vmax.f32 %v1073_v44, 0.0  ;;  %v2587_v44 = vld [vmem:[%s3361_s9 + $0x10] sm:$0xff]   ;;  %v2590_v47 = vld [vmem:[%s3361_s9 + $0x60] sm:$0xff]  }
 0x1c8   : > { %v1127_v50 = vmax.f32 %v1075_v46, 0.0  ;;  %v2589_v46 = vld [vmem:[%s3361_s9 + $0x18] sm:$0xff]  }
 0x1c9   : > { %v1128_v52 = vmax.f32 %v1077_v48, 0.0  ;;  %v2591_v48 = vld [vmem:[%s3361_s9 + $0x20] sm:$0xff]  }
 0x1ca   : > { %v1149_v53 = vpack.c.bf16 %v1127_v50, %v1125_v49  ;;  %v2592_v49 = vld [vmem:[%s3361_s9 + $0x68] sm:$0xff]   ;;  %v1189_v50 = vld [vmem:[%s3358_s6] sm:$0x3] }
 0x1cb   : > { %v1150_v54 = vpack.c.bf16 %v1128_v52, %v1126_v51  ;;  %v3196_v51 = vrot.slane %v1189_v50, %v2931_v1  ;;  %v3199_v52 = vrot.slane %v1189_v50, %v2929_v63 }
 0x1cd   : > { %v1080_v55 = vpop.f32.mrb[20].mxu0  ;;  %1433 = vmatprep.mubr.bf16.mxu1 %v1150_v54 }
 0x1ce   : > { %v1081_v56 = vadd.f32 %v1080_v55, %v3122_v34  ;;  %v1082_v57 = vpop.f32.mrb[21].mxu0  ;;  %1434 = vmatmul.mubr.bf16.gmra.mrb[16].mxu1 %v1149_v53 }
 0x1cf   : > { %v1083_v58 = vadd.f32 %v1082_v57, %v3125_v35  ;;  %v1084_v59 = vpop.f32.mrb[22].mxu0 }
 0x1d0   : > { %v1085_v60 = vadd.f32 %v1084_v59, %v3122_v34  ;;  %v1086_v61 = vpop.f32.mrb[23].mxu0  ;;  %v1129_v0 = vmax.f32 %v1081_v56, 0.0 }
 0x1d1   : > { %v1087_v62 = vadd.f32 %v1086_v61, %v3125_v35  ;;  %v1130_v3 = vmax.f32 %v1083_v58, 0.0 }
 0x1d2   : > { %v1131_v2 = vmax.f32 %v1085_v60, 0.0 }
 0x1d3   : > { %v1132_v14 = vmax.f32 %v1087_v62, 0.0 }
 0x1d4   : > { %v1151_v4 = vpack.c.bf16 %v1131_v2, %v1129_v0 }
 0x1d5   : > { %v1152_v15 = vpack.c.bf16 %v1132_v14, %v1130_v3 }
 0x1d7   : > { %1443 = vmatprep.mubr.bf16.mxu1 %v1152_v15 }
 0x1d8   : > { %1444 = vmatmul.mubr.bf16.gmra.mrb[20].mxu1 %v1151_v4 }
 0x1db   : > { %v1090_v5 = vpop.f32.mrb[24].mxu0 }
 0x1dc   : > { %v1091_v12 = vadd.f32 %v1090_v5, %v3122_v34  ;;  %v1092_v13 = vpop.f32.mrb[25].mxu0 }
 0x1dd   : > { %v1093_v6 = vadd.f32 %v1092_v13, %v3125_v35  ;;  %v1094_v27 = vpop.f32.mrb[26].mxu0 }
 0x1de   : > { %v1095_v32 = vadd.f32 %v1094_v27, %v3122_v34  ;;  %v1096_v7 = vpop.f32.mrb[27].mxu0  ;;  %v1133_v9 = vmax.f32 %v1091_v12, 0.0 }
 0x1df   : > { %v1097_v8 = vadd.f32 %v1096_v7, %v3125_v35  ;;  %v1134_v11 = vmax.f32 %v1093_v6, 0.0 }
 0x1e0   : > { %v1135_v10 = vmax.f32 %v1095_v32, 0.0 }
 0x1e1   : > { %v1136_v16 = vmax.f32 %v1097_v8, 0.0 }
 0x1e2   : > { %v1153_v17 = vpack.c.bf16 %v1135_v10, %v1133_v9 }
 0x1e3   : > { %v1154_v18 = vpack.c.bf16 %v1136_v16, %v1134_v11 }
 0x1e5   : > { %v1100_v19 = vpop.f32.mrb[28].mxu0  ;;  %1453 = vmatprep.mubr.bf16.mxu1 %v1154_v18 }
 0x1e6   : > { %v1101_v20 = vadd.f32 %v1100_v19, %v3122_v34  ;;  %v1102_v21 = vpop.f32.mrb[29].mxu0  ;;  %1454 = vmatmul.mubr.bf16.gmra.mrb[24].mxu1 %v1153_v17 }
 0x1e7   : > { %v1103_v22 = vadd.f32 %v1102_v21, %v3125_v35  ;;  %v1104_v23 = vpop.f32.mrb[30].mxu0 }
 0x1e8   : > { %v1105_v24 = vadd.f32 %v1104_v23, %v3122_v34  ;;  %v1106_v25 = vpop.f32.mrb[31].mxu0  ;;  %v1137_v28 = vmax.f32 %v1101_v20, 0.0  ;;  %v2582_v34 = vld [vmem:[%s3361_s9 + $0x40] sm:$0xff]  }
 0x1e9   : > { %v1107_v26 = vadd.f32 %v1106_v25, %v3125_v35  ;;  %v1138_v30 = vmax.f32 %v1103_v22, 0.0  ;;  %v2583_v35 = vld [vmem:[%s3361_s9] sm:$0xff]   ;;  %2330 = vmatprep.subr.bf16.mxu1 %v2582_v34 }
 0x1ea   : > { %v1139_v29 = vmax.f32 %v1105_v24, 0.0  ;;  %2331 = vmatpush3.bf16.msra.mxu1 %v2583_v35 }
 0x1eb   : > { %v1140_v31 = vmax.f32 %v1107_v26, 0.0  ;;  %2332 = vmatprep.subr.bf16.mxu1 %v2584_v41 }
 0x1ec   : > { %v1155_v33 = vpack.c.bf16 %v1139_v29, %v1137_v28 }
 0x1ed   : > { %v1156_v36 = vpack.c.bf16 %v1140_v31, %v1138_v30 }
 0x1ee   : > { %2333 = vmatpush3.bf16.msra.mxu1 %v2585_v42 }
 0x1ef   : > { %1463 = vmatprep.mubr.bf16.mxu1 %v1156_v36  ;;  %2334 = vmatprep.subr.bf16.mxu1 %v2586_v43 }
 0x1f0   : > { %1464 = vmatmul.mubr.bf16.gmra.mrb[28].mxu1 %v1155_v33 }
 0x1f2   : > { %2335 = vmatpush3.bf16.msra.mxu1 %v2587_v44 }
 0x1f3   : > { %2336 = vmatprep.subr.bf16.mxu1 %v2588_v45 }
 0x1f6   : > { %2337 = vmatpush3.bf16.msra.mxu1 %v2589_v46 }
 0x1f7   : > { %2338 = vmatprep.subr.bf16.mxu1 %v2590_v47 }
 0x1fa   : > { %2339 = vmatpush3.bf16.msra.mxu1 %v2591_v48 }
 0x1fb   : > { %2340 = vmatprep.subr.bf16.mxu1 %v2592_v49 }
 0x271   : > { %v1395_v53 = vpop.f32.mrb[0].mxu1 }
 0x272   : > { %v1396_v54 = vadd.f32 %v1395_v53, %v3196_v51  ;;  %v1397_v55 = vpop.f32.mrb[1].mxu1 }
 0x273   : > { %v1398_v56 = vadd.f32 %v1397_v55, %v3199_v52  ;;  %v1399_v57 = vpop.f32.mrb[2].mxu1 }
 0x274   : > { %v1400_v58 = vadd.f32 %v1399_v57, %v3196_v51  ;;  %v1401_v59 = vpop.f32.mrb[3].mxu1  ;;  %v1474_v61 = vmax.f32 %v1396_v54, 0.0 }
 0x275   : > { %v1402_v60 = vadd.f32 %v1401_v59, %v3199_v52  ;;  %v1475_v0 = vmax.f32 %v1398_v56, 0.0 }
 0x276   : > { %v1476_v62 = vmax.f32 %v1400_v58, 0.0 }
 0x277   : > { %v1477_v2 = vmax.f32 %v1402_v60, 0.0 }
 0x278   : > { %v1506_v3 = vpack.c.bf16 %v1476_v62, %v1474_v61 }
 0x279   : > { %v1507_v14 = vpack.c.bf16 %v1477_v2, %v1475_v0 }
 0x27b   : > { %v1405_v4 = vpop.f32.mrb[4].mxu1  ;;  %1758 = vmatprep.mubr.bf16.mxu0 %v1507_v14 }
 0x27c   : > { %v1406_v15 = vadd.f32 %v1405_v4, %v3196_v51  ;;  %v1407_v5 = vpop.f32.mrb[5].mxu1  ;;  %1759 = vmatmul.mubr.bf16.vlgmr.msra.gmra.mrb[32].mxu0 %v1506_v3 }
 0x27d   : > { %v1408_v12 = vadd.f32 %v1407_v5, %v3199_v52  ;;  %v1409_v13 = vpop.f32.mrb[6].mxu1 }
 0x27e   : > { %v1410_v6 = vadd.f32 %v1409_v13, %v3196_v51  ;;  %v1411_v27 = vpop.f32.mrb[7].mxu1  ;;  %v1478_v7 = vmax.f32 %v1406_v15, 0.0 }
 0x27f   : > { %v1412_v32 = vadd.f32 %v1411_v27, %v3199_v52  ;;  %v1479_v9 = vmax.f32 %v1408_v12, 0.0 }
 0x280   : > { %v1480_v8 = vmax.f32 %v1410_v6, 0.0 }
 0x281   : > { %v1481_v10 = vmax.f32 %v1412_v32, 0.0 }
 0x282   : > { %v1508_v11 = vpack.c.bf16 %v1480_v8, %v1478_v7 }
 0x283   : > { %v1509_v16 = vpack.c.bf16 %v1481_v10, %v1479_v9 }
 0x285   : > { %1768 = vmatprep.mubr.bf16.mxu0 %v1509_v16 }
 0x286   : > { %1769 = vmatmul.mubr.bf16.gmra.mrb[36].mxu0 %v1508_v11 }
 0x289   : > { %v1415_v17 = vpop.f32.mrb[8].mxu1 }
 0x28a   : > { %v1416_v18 = vadd.f32 %v1415_v17, %v3196_v51  ;;  %v1417_v19 = vpop.f32.mrb[9].mxu1 }
 0x28b   : > { %v1418_v20 = vadd.f32 %v1417_v19, %v3199_v52  ;;  %v1419_v21 = vpop.f32.mrb[10].mxu1 }
 0x28c   : > { %v1420_v22 = vadd.f32 %v1419_v21, %v3196_v51  ;;  %v1421_v23 = vpop.f32.mrb[11].mxu1  ;;  %v1482_v25 = vmax.f32 %v1416_v18, 0.0 }
 0x28d   : > { %v1422_v24 = vadd.f32 %v1421_v23, %v3199_v52  ;;  %v1483_v28 = vmax.f32 %v1418_v20, 0.0 }
 0x28e   : > { %v1484_v26 = vmax.f32 %v1420_v22, 0.0 }
 0x28f   : > { %v1485_v29 = vmax.f32 %v1422_v24, 0.0 }
 0x290   : > { %v1510_v30 = vpack.c.bf16 %v1484_v26, %v1482_v25 }
 0x291   : > { %v1511_v31 = vpack.c.bf16 %v1485_v29, %v1483_v28 }
 0x293   : > { %v1425_v33 = vpop.f32.mrb[12].mxu1  ;;  %1778 = vmatprep.mubr.bf16.mxu0 %v1511_v31 }
 0x294   : > { %v1426_v36 = vadd.f32 %v1425_v33, %v3196_v51  ;;  %v1427_v37 = vpop.f32.mrb[13].mxu1  ;;  %1779 = vmatmul.mubr.bf16.gmra.mrb[40].mxu0 %v1510_v30 }
 0x295   : > { %v1428_v38 = vadd.f32 %v1427_v37, %v3199_v52  ;;  %v1429_v39 = vpop.f32.mrb[14].mxu1 }
 0x296   : > { %v1430_v40 = vadd.f32 %v1429_v39, %v3196_v51  ;;  %v1431_v34 = vpop.f32.mrb[15].mxu1  ;;  %v1486_v41 = vmax.f32 %v1426_v36, 0.0 }
 0x297   : > { %v1432_v35 = vadd.f32 %v1431_v34, %v3199_v52  ;;  %v1487_v43 = vmax.f32 %v1428_v38, 0.0 }
 0x298   : > { %v1488_v42 = vmax.f32 %v1430_v40, 0.0 }
 0x299   : > { %v1489_v44 = vmax.f32 %v1432_v35, 0.0 }
 0x29a   : > { %v1512_v45 = vpack.c.bf16 %v1488_v42, %v1486_v41 }
 0x29b   : > { %v1513_v46 = vpack.c.bf16 %v1489_v44, %v1487_v43  ;;  %v2593_v43 = vld [vmem:[%s3361_s9 + $0x28] sm:$0xff]   ;;  %v2596_v44 = vld [vmem:[%s3361_s9 + $0x78] sm:$0xff]  }
 0x29c   : > { %2341 = vmatpush3.bf16.msra.mxu1 %v2593_v43 }
 0x29d   : > { %1788 = vmatprep.mubr.bf16.mxu0 %v1513_v46  ;;  %v1554_v46 = vld [vmem:[%s3360_s8] sm:$0x3] }
 0x29e   : > { %1789 = vmatmul.mubr.bf16.gmra.mrb[44].mxu0 %v1512_v45  ;;  %v2597_v45 = vld [vmem:[%s3361_s9 + $0x38] sm:$0xff]  }
 0x2a1   : > { %v1435_v47 = vpop.f32.mrb[16].mxu1 }
 0x2a2   : > { %v1436_v48 = vadd.f32 %v1435_v47, %v3196_v51  ;;  %v1437_v49 = vpop.f32.mrb[17].mxu1  ;;  %v3252_v47 = vrot.slane %v1554_v46, %v2931_v1 }
 0x2a3   : > { %v1438_v50 = vadd.f32 %v1437_v49, %v3199_v52  ;;  %v1439_v53 = vpop.f32.mrb[18].mxu1 }
 0x2a4   : > { %v1440_v54 = vadd.f32 %v1439_v53, %v3196_v51  ;;  %v1441_v55 = vpop.f32.mrb[19].mxu1  ;;  %v1490_v57 = vmax.f32 %v1436_v48, 0.0  ;;  %v3255_v48 = vrot.slane %v1554_v46, %v2929_v63 }
 0x2a5   : > { %v1442_v56 = vadd.f32 %v1441_v55, %v3199_v52  ;;  %v1491_v59 = vmax.f32 %v1438_v50, 0.0 }
 0x2a6   : > { %v1492_v58 = vmax.f32 %v1440_v54, 0.0 }
 0x2a7   : > { %v1493_v60 = vmax.f32 %v1442_v56, 0.0 }
 0x2a8   : > { %v1514_v61 = vpack.c.bf16 %v1492_v58, %v1490_v57 }
 0x2a9   : > { %v1515_v62 = vpack.c.bf16 %v1493_v60, %v1491_v59 }
 0x2ab   : > { %v1445_v0 = vpop.f32.mrb[20].mxu1  ;;  %1798 = vmatprep.mubr.bf16.mxu0 %v1515_v62 }
 0x2ac   : > { %v1446_v2 = vadd.f32 %v1445_v0, %v3196_v51  ;;  %v1447_v3 = vpop.f32.mrb[21].mxu1  ;;  %1799 = vmatmul.mubr.bf16.gmra.mrb[48].mxu0 %v1514_v61 }
 0x2ad   : > { %v1448_v14 = vadd.f32 %v1447_v3, %v3199_v52  ;;  %v1449_v4 = vpop.f32.mrb[22].mxu1 }
 0x2ae   : > { %v1450_v15 = vadd.f32 %v1449_v4, %v3196_v51  ;;  %v1451_v5 = vpop.f32.mrb[23].mxu1  ;;  %v1494_v13 = vmax.f32 %v1446_v2, 0.0 }
 0x2af   : > { %v1452_v12 = vadd.f32 %v1451_v5, %v3199_v52  ;;  %v1495_v27 = vmax.f32 %v1448_v14, 0.0 }
 0x2b0   : > { %v1496_v6 = vmax.f32 %v1450_v15, 0.0 }
 0x2b1   : > { %v1497_v32 = vmax.f32 %v1452_v12, 0.0 }
 0x2b2   : > { %v1516_v7 = vpack.c.bf16 %v1496_v6, %v1494_v13 }
 0x2b3   : > { %v1517_v8 = vpack.c.bf16 %v1497_v32, %v1495_v27 }
 0x2b5   : > { %1808 = vmatprep.mubr.bf16.mxu0 %v1517_v8 }
 0x2b6   : > { %1809 = vmatmul.mubr.bf16.gmra.mrb[52].mxu0 %v1516_v7 }
 0x2b9   : > { %v1455_v9 = vpop.f32.mrb[24].mxu1 }
 0x2ba   : > { %v1456_v10 = vadd.f32 %v1455_v9, %v3196_v51  ;;  %v1457_v11 = vpop.f32.mrb[25].mxu1 }
 0x2bb   : > { %v1458_v16 = vadd.f32 %v1457_v11, %v3199_v52  ;;  %v1459_v17 = vpop.f32.mrb[26].mxu1 }
 0x2bc   : > { %v1460_v18 = vadd.f32 %v1459_v17, %v3196_v51  ;;  %v1461_v19 = vpop.f32.mrb[27].mxu1  ;;  %v1498_v21 = vmax.f32 %v1456_v10, 0.0 }
 0x2bd   : > { %v1462_v20 = vadd.f32 %v1461_v19, %v3199_v52  ;;  %v1499_v23 = vmax.f32 %v1458_v16, 0.0 }
 0x2be   : > { %v1500_v22 = vmax.f32 %v1460_v18, 0.0 }
 0x2bf   : > { %v1501_v24 = vmax.f32 %v1462_v20, 0.0 }
 0x2c0   : > { %v1518_v25 = vpack.c.bf16 %v1500_v22, %v1498_v21 }
 0x2c1   : > { %v1519_v26 = vpack.c.bf16 %v1501_v24, %v1499_v23 }
 0x2c3   : > { %v1465_v28 = vpop.f32.mrb[28].mxu1  ;;  %1818 = vmatprep.mubr.bf16.mxu0 %v1519_v26 }
 0x2c4   : > { %v1466_v29 = vadd.f32 %v1465_v28, %v3196_v51  ;;  %v1467_v30 = vpop.f32.mrb[29].mxu1  ;;  %1819 = vmatmul.mubr.bf16.gmra.mrb[56].mxu0 %v1518_v25 }
 0x2c5   : > { %v1468_v31 = vadd.f32 %v1467_v30, %v3199_v52  ;;  %v1469_v33 = vpop.f32.mrb[30].mxu1 }
 0x2c6   : > { %v1470_v36 = vadd.f32 %v1469_v33, %v3196_v51  ;;  %v1471_v37 = vpop.f32.mrb[31].mxu1  ;;  %v1502_v39 = vmax.f32 %v1466_v29, 0.0  ;;  %v2594_v51 = vld [vmem:[%s3361_s9 + $0x70] sm:$0xff]  }
 0x2c7   : > { %v1472_v38 = vadd.f32 %v1471_v37, %v3199_v52  ;;  %v1503_v34 = vmax.f32 %v1468_v31, 0.0  ;;  %v2595_v52 = vld [vmem:[%s3361_s9 + $0x30] sm:$0xff]   ;;  %2342 = vmatprep.subr.bf16.mxu1 %v2594_v51 }
 0x2c8   : > { %v1504_v40 = vmax.f32 %v1470_v36, 0.0  ;;  %2343 = vmatpush3.bf16.msra.mxu1 %v2595_v52 }
 0x2c9   : > { %v1505_v35 = vmax.f32 %v1472_v38, 0.0  ;;  %2344 = vmatprep.subr.bf16.mxu1 %v2596_v44 }
 0x2ca   : > { %v1520_v41 = vpack.c.bf16 %v1504_v40, %v1502_v39 }
 0x2cb   : > { %v1521_v42 = vpack.c.bf16 %v1505_v35, %v1503_v34 }
 0x2cc   : > { %2345 = vmatpush3.bf16.msra.mxu1 %v2597_v45 }
 0x2cd   : > { %1828 = vmatprep.mubr.bf16.mxu0 %v1521_v42 }
 0x2ce   : > { %1829 = vmatmul.mubr.bf16.gmra.mrb[60].mxu0 %v1520_v41 }
 0x34f   : > { %v1760_v49 = vpop.f32.mrb[32].mxu0 }
 0x350   : > { %v1761_v50 = vadd.f32 %v1760_v49, %v3252_v47  ;;  %v1762_v53 = vpop.f32.mrb[33].mxu0 }
 0x351   : > { %v1763_v54 = vadd.f32 %v1762_v53, %v3255_v48  ;;  %v1764_v55 = vpop.f32.mrb[34].mxu0 }
 0x352   : > { %v1765_v56 = vadd.f32 %v1764_v55, %v3252_v47  ;;  %v1766_v57 = vpop.f32.mrb[35].mxu0  ;;  %v1839_v59 = vmax.f32 %v1761_v50, 0.0 }
 0x353   : > { %v1767_v58 = vadd.f32 %v1766_v57, %v3255_v48  ;;  %v1840_v61 = vmax.f32 %v1763_v54, 0.0 }
 0x354   : > { %v1841_v60 = vmax.f32 %v1765_v56, 0.0 }
 0x355   : > { %v1842_v1 = vmax.f32 %v1767_v58, 0.0 }
 0x356   : > { %v1871_v62 = vpack.c.bf16 %v1841_v60, %v1839_v59 }
 0x357   : > { %v1872_v0 = vpack.c.bf16 %v1842_v1, %v1840_v61 }
 0x359   : > { %v1770_v63 = vpop.f32.mrb[36].mxu0  ;;  %2054 = vmatprep.mubr.bf16.mxu1 %v1872_v0 }
 0x35a   : > { %v1771_v2 = vadd.f32 %v1770_v63, %v3252_v47  ;;  %v1772_v3 = vpop.f32.mrb[37].mxu0  ;;  %2055 = vmatmul.mubr.bf16.vlgmr.msra.gmra.mrb[32].mxu1 %v1871_v62 }
 0x35b   : > { %v1773_v14 = vadd.f32 %v1772_v3, %v3255_v48  ;;  %v1774_v4 = vpop.f32.mrb[38].mxu0 }
 0x35c   : > { %v1775_v15 = vadd.f32 %v1774_v4, %v3252_v47  ;;  %v1776_v5 = vpop.f32.mrb[39].mxu0  ;;  %v1843_v13 = vmax.f32 %v1771_v2, 0.0 }
 0x35d   : > { %v1777_v12 = vadd.f32 %v1776_v5, %v3255_v48  ;;  %v1844_v27 = vmax.f32 %v1773_v14, 0.0 }
 0x35e   : > { %v1845_v6 = vmax.f32 %v1775_v15, 0.0 }
 0x35f   : > { %v1846_v32 = vmax.f32 %v1777_v12, 0.0 }
 0x360   : > { %v1873_v7 = vpack.c.bf16 %v1845_v6, %v1843_v13 }
 0x361   : > { %v1874_v8 = vpack.c.bf16 %v1846_v32, %v1844_v27 }
 0x363   : > { %2062 = vmatprep.mubr.bf16.mxu1 %v1874_v8 }
 0x364   : > { %2063 = vmatmul.mubr.bf16.gmra.mrb[36].mxu1 %v1873_v7 }
 0x367   : > { %v1780_v9 = vpop.f32.mrb[40].mxu0 }
 0x368   : > { %v1781_v10 = vadd.f32 %v1780_v9, %v3252_v47  ;;  %v1782_v11 = vpop.f32.mrb[41].mxu0 }
 0x369   : > { %v1783_v16 = vadd.f32 %v1782_v11, %v3255_v48  ;;  %v1784_v17 = vpop.f32.mrb[42].mxu0 }
 0x36a   : > { %v1785_v18 = vadd.f32 %v1784_v17, %v3252_v47  ;;  %v1786_v19 = vpop.f32.mrb[43].mxu0  ;;  %v1847_v21 = vmax.f32 %v1781_v10, 0.0 }
 0x36b   : > { %v1787_v20 = vadd.f32 %v1786_v19, %v3255_v48  ;;  %v1848_v23 = vmax.f32 %v1783_v16, 0.0 }
 0x36c   : > { %v1849_v22 = vmax.f32 %v1785_v18, 0.0 }
 0x36d   : > { %v1850_v24 = vmax.f32 %v1787_v20, 0.0 }
 0x36e   : > { %v1875_v25 = vpack.c.bf16 %v1849_v22, %v1847_v21 }
 0x36f   : > { %v1876_v26 = vpack.c.bf16 %v1850_v24, %v1848_v23 }
 0x371   : > { %v1790_v28 = vpop.f32.mrb[44].mxu0  ;;  %2070 = vmatprep.mubr.bf16.mxu1 %v1876_v26 }
 0x372   : > { %v1791_v29 = vadd.f32 %v1790_v28, %v3252_v47  ;;  %v1792_v30 = vpop.f32.mrb[45].mxu0  ;;  %2071 = vmatmul.mubr.bf16.gmra.mrb[40].mxu1 %v1875_v25 }
 0x373   : > { %v1793_v31 = vadd.f32 %v1792_v30, %v3255_v48  ;;  %v1794_v33 = vpop.f32.mrb[46].mxu0 }
 0x374   : > { %v1795_v36 = vadd.f32 %v1794_v33, %v3252_v47  ;;  %v1796_v37 = vpop.f32.mrb[47].mxu0  ;;  %v1851_v39 = vmax.f32 %v1791_v29, 0.0 }
 0x375   : > { %v1797_v38 = vadd.f32 %v1796_v37, %v3255_v48  ;;  %v1852_v34 = vmax.f32 %v1793_v31, 0.0 }
 0x376   : > { %v1853_v40 = vmax.f32 %v1795_v36, 0.0 }
 0x377   : > { %v1854_v35 = vmax.f32 %v1797_v38, 0.0 }
 0x378   : > { %v1877_v41 = vpack.c.bf16 %v1853_v40, %v1851_v39  ;;  %v3292_v40 = vld [vmem:[%s3362_s10] ss:$0 sm:$0xff] }
 0x379   : > { %v1878_v42 = vpack.c.bf16 %v1854_v35, %v1852_v34 }
 0x37b   : > { %2078 = vmatprep.mubr.bf16.mxu1 %v1878_v42 }
 0x37c   : > { %2079 = vmatmul.mubr.bf16.gmra.mrb[44].mxu1 %v1877_v41 }
 0x37f   : > { %v1800_v43 = vpop.f32.mrb[48].mxu0 }
 0x380   : > { %v1801_v51 = vadd.f32 %v1800_v43, %v3252_v47  ;;  %v1802_v52 = vpop.f32.mrb[49].mxu0 }
 0x381   : > { %v1803_v44 = vadd.f32 %v1802_v52, %v3255_v48  ;;  %v1804_v45 = vpop.f32.mrb[50].mxu0 }
 0x382   : > { %v1805_v46 = vadd.f32 %v1804_v45, %v3252_v47  ;;  %v1806_v49 = vpop.f32.mrb[51].mxu0  ;;  %v1855_v53 = vmax.f32 %v1801_v51, 0.0 }
 0x383   : > { %v1807_v50 = vadd.f32 %v1806_v49, %v3255_v48  ;;  %v1856_v55 = vmax.f32 %v1803_v44, 0.0 }
 0x384   : > { %v1857_v54 = vmax.f32 %v1805_v46, 0.0 }
 0x385   : > { %v1858_v56 = vmax.f32 %v1807_v50, 0.0 }
 0x386   : > { %v1879_v57 = vpack.c.bf16 %v1857_v54, %v1855_v53 }
 0x387   : > { %v1880_v58 = vpack.c.bf16 %v1858_v56, %v1856_v55 }
 0x389   : > { %v1810_v59 = vpop.f32.mrb[52].mxu0  ;;  %2086 = vmatprep.mubr.bf16.mxu1 %v1880_v58 }
 0x38a   : > { %v1811_v60 = vadd.f32 %v1810_v59, %v3252_v47  ;;  %v1812_v61 = vpop.f32.mrb[53].mxu0  ;;  %2087 = vmatmul.mubr.bf16.gmra.mrb[48].mxu1 %v1879_v57 }
 0x38b   : > { %v1813_v1 = vadd.f32 %v1812_v61, %v3255_v48  ;;  %v1814_v62 = vpop.f32.mrb[54].mxu0 }
 0x38c   : > { %v1815_v0 = vadd.f32 %v1814_v62, %v3252_v47  ;;  %v1816_v63 = vpop.f32.mrb[55].mxu0  ;;  %v1859_v3 = vmax.f32 %v1811_v60, 0.0 }
 0x38d   : > { %v1817_v2 = vadd.f32 %v1816_v63, %v3255_v48  ;;  %v1860_v4 = vmax.f32 %v1813_v1, 0.0 }
 0x38e   : > { %v1861_v14 = vmax.f32 %v1815_v0, 0.0 }
 0x38f   : > { %v1862_v15 = vmax.f32 %v1817_v2, 0.0 }
 0x390   : > { %v1881_v5 = vpack.c.bf16 %v1861_v14, %v1859_v3 }
 0x391   : > { %v1882_v12 = vpack.c.bf16 %v1862_v15, %v1860_v4 }
 0x393   : > { %2094 = vmatprep.mubr.bf16.mxu1 %v1882_v12 }
 0x394   : > { %2095 = vmatmul.mubr.bf16.gmra.mrb[52].mxu1 %v1881_v5 }
 0x397   : > { %v1820_v13 = vpop.f32.mrb[56].mxu0 }
 0x398   : > { %v1821_v6 = vadd.f32 %v1820_v13, %v3252_v47  ;;  %v1822_v27 = vpop.f32.mrb[57].mxu0 }
 0x399   : > { %v1823_v32 = vadd.f32 %v1822_v27, %v3255_v48  ;;  %v1824_v7 = vpop.f32.mrb[58].mxu0 }
 0x39a   : > { %v1825_v8 = vadd.f32 %v1824_v7, %v3252_v47  ;;  %v1826_v9 = vpop.f32.mrb[59].mxu0  ;;  %v1863_v11 = vmax.f32 %v1821_v6, 0.0 }
 0x39b   : > { %v1827_v10 = vadd.f32 %v1826_v9, %v3255_v48  ;;  %v1864_v17 = vmax.f32 %v1823_v32, 0.0 }
 0x39c   : > { %v1865_v16 = vmax.f32 %v1825_v8, 0.0 }
 0x39d   : > { %v1866_v18 = vmax.f32 %v1827_v10, 0.0 }
 0x39e   : > { %v1883_v19 = vpack.c.bf16 %v1865_v16, %v1863_v11 }
 0x39f   : > { %v1884_v20 = vpack.c.bf16 %v1866_v18, %v1864_v17 }
 0x3a1   : > { %v1830_v21 = vpop.f32.mrb[60].mxu0  ;;  %2102 = vmatprep.mubr.bf16.mxu1 %v1884_v20 }
 0x3a2   : > { %v1831_v22 = vadd.f32 %v1830_v21, %v3252_v47  ;;  %v1832_v23 = vpop.f32.mrb[61].mxu0  ;;  %2103 = vmatmul.mubr.bf16.gmra.mrb[56].mxu1 %v1883_v19 }
 0x3a3   : > { %v1833_v24 = vadd.f32 %v1832_v23, %v3255_v48  ;;  %v1834_v25 = vpop.f32.mrb[62].mxu0 }
 0x3a4   : > { %v1835_v26 = vadd.f32 %v1834_v25, %v3252_v47  ;;  %v1836_v28 = vpop.f32.mrb[63].mxu0  ;;  %v1867_v30 = vmax.f32 %v1831_v22, 0.0 }
 0x3a5   : > { %v1837_v29 = vadd.f32 %v1836_v28, %v3255_v48  ;;  %v1868_v33 = vmax.f32 %v1833_v24, 0.0 }
 0x3a6   : > { %v1869_v31 = vmax.f32 %v1835_v26, 0.0 }
 0x3a7   : > { %v1870_v36 = vmax.f32 %v1837_v29, 0.0 }
 0x3a8   : > { %v1885_v37 = vpack.c.bf16 %v1869_v31, %v1867_v30 }
 0x3a9   : > { %v1886_v38 = vpack.c.bf16 %v1870_v36, %v1868_v33 }
 0x3ab   : > { %2110 = vmatprep.mubr.bf16.mxu1 %v1886_v38 }
 0x3ac   : > { %2111 = vmatmul.mubr.bf16.gmra.mrb[60].mxu1 %v1885_v37 }
 0x42d   : > { %v2346_v39 = vpop.f32.mrb[32].mxu1 }
 0x42e   : > { %v2347_v34 = vpop.f32.mrb[33].mxu1 }
 0x42f   : > { %v2348_v47 = vadd.f32 %v2347_v34, %v2346_v39  ;;  %v2349_v35 = vpop.f32.mrb[34].mxu1 }
 0x430   : > { %v2350_v48 = vpop.f32.mrb[35].mxu1 }
 0x431   : > { %v2057_v41 = vadd.f32 %v2348_v47, %v3292_v40  ;;  %v2351_v42 = vadd.f32 %v2350_v48, %v2349_v35 }
 0x433   : > { %2120 = vst.msk [vmem:[%s3299_s25] sm:$0xff] %vm2119_vm0, %v2057_v41  ;;  %v2060_v43 = vadd.f32 %v2351_v42, %v3292_v40 }
 0x435   : > { %2121 = vst.msk [vmem:[%s3299_s25 + $0x8] sm:$0xff] %vm2119_vm0, %v2060_v43 }
 0x437   : > { %v2352_v51 = vpop.f32.mrb[36].mxu1 }
 0x438   : > { %v2353_v52 = vpop.f32.mrb[37].mxu1 }
 0x439   : > { %v2354_v44 = vadd.f32 %v2353_v52, %v2352_v51  ;;  %v2355_v45 = vpop.f32.mrb[38].mxu1 }
 0x43a   : > { %v2356_v46 = vpop.f32.mrb[39].mxu1 }
 0x43b   : > { %v2065_v49 = vadd.f32 %v2354_v44, %v3292_v40  ;;  %v2357_v50 = vadd.f32 %v2356_v46, %v2355_v45 }
 0x43d   : > { %2122 = vst.msk [vmem:[%s3299_s25 + $0x10] sm:$0xff] %vm2119_vm0, %v2065_v49  ;;  %v2068_v53 = vadd.f32 %v2357_v50, %v3292_v40 }
 0x43f   : > { %2123 = vst.msk [vmem:[%s3299_s25 + $0x18] sm:$0xff] %vm2119_vm0, %v2068_v53 }
 0x445   : > { %v2358_v54 = vpop.f32.mrb[40].mxu1 }
 0x446   : > { %v2359_v55 = vpop.f32.mrb[41].mxu1 }
 0x447   : > { %v2360_v56 = vadd.f32 %v2359_v55, %v2358_v54  ;;  %v2361_v57 = vpop.f32.mrb[42].mxu1 }
 0x448   : > { %v2362_v58 = vpop.f32.mrb[43].mxu1 }
 0x449   : > { %v2073_v59 = vadd.f32 %v2360_v56, %v3292_v40  ;;  %v2363_v60 = vadd.f32 %v2362_v58, %v2361_v57 }
 0x44b   : > { %2124 = vst.msk [vmem:[%s3299_s25 + $0x20] sm:$0xff] %vm2119_vm0, %v2073_v59  ;;  %v2076_v61 = vadd.f32 %v2363_v60, %v3292_v40 }
 0x44d   : > { %2125 = vst.msk [vmem:[%s3299_s25 + $0x28] sm:$0xff] %vm2119_vm0, %v2076_v61 }
 0x44f   : > { %v2364_v1 = vpop.f32.mrb[44].mxu1 }
 0x450   : > { %v2365_v62 = vpop.f32.mrb[45].mxu1 }
 0x451   : > { %v2366_v0 = vadd.f32 %v2365_v62, %v2364_v1  ;;  %v2367_v63 = vpop.f32.mrb[46].mxu1 }
 0x452   : > { %v2368_v2 = vpop.f32.mrb[47].mxu1 }
 0x453   : > { %v2081_v3 = vadd.f32 %v2366_v0, %v3292_v40  ;;  %v2369_v14 = vadd.f32 %v2368_v2, %v2367_v63 }
 0x455   : > { %2126 = vst.msk [vmem:[%s3299_s25 + $0x30] sm:$0xff] %vm2119_vm0, %v2081_v3  ;;  %v2084_v4 = vadd.f32 %v2369_v14, %v3292_v40 }
 0x457   : > { %2127 = vst.msk [vmem:[%s3299_s25 + $0x38] sm:$0xff] %vm2119_vm0, %v2084_v4 }
 0x45d   : > { %v2370_v15 = vpop.f32.mrb[48].mxu1 }
 0x45e   : > { %v2371_v5 = vpop.f32.mrb[49].mxu1 }
 0x45f   : > { %v2372_v12 = vadd.f32 %v2371_v5, %v2370_v15  ;;  %v2373_v13 = vpop.f32.mrb[50].mxu1 }
 0x460   : > { %v2374_v6 = vpop.f32.mrb[51].mxu1 }
 0x461   : > { %v2089_v27 = vadd.f32 %v2372_v12, %v3292_v40  ;;  %v2375_v32 = vadd.f32 %v2374_v6, %v2373_v13 }
 0x463   : > { %2128 = vst.msk [vmem:[%s3299_s25 + $0x40] sm:$0xff] %vm2119_vm0, %v2089_v27  ;;  %v2092_v7 = vadd.f32 %v2375_v32, %v3292_v40 }
 0x465   : > { %2129 = vst.msk [vmem:[%s3299_s25 + $0x48] sm:$0xff] %vm2119_vm0, %v2092_v7 }
 0x467   : > { %v2376_v8 = vpop.f32.mrb[52].mxu1 }
 0x468   : > { %v2377_v9 = vpop.f32.mrb[53].mxu1 }
 0x469   : > { %v2378_v10 = vadd.f32 %v2377_v9, %v2376_v8  ;;  %v2379_v11 = vpop.f32.mrb[54].mxu1 }
 0x46a   : > { %v2380_v16 = vpop.f32.mrb[55].mxu1 }
 0x46b   : > { %v2097_v17 = vadd.f32 %v2378_v10, %v3292_v40  ;;  %v2381_v18 = vadd.f32 %v2380_v16, %v2379_v11 }
 0x46d   : > { %2130 = vst.msk [vmem:[%s3299_s25 + $0x50] sm:$0xff] %vm2119_vm0, %v2097_v17  ;;  %v2100_v19 = vadd.f32 %v2381_v18, %v3292_v40 }
 0x46f   : > { %2131 = vst.msk [vmem:[%s3299_s25 + $0x58] sm:$0xff] %vm2119_vm0, %v2100_v19 }
 0x475   : > { %v2382_v20 = vpop.f32.mrb[56].mxu1 }
 0x476   : > { %v2383_v21 = vpop.f32.mrb[57].mxu1 }
 0x477   : > { %v2384_v22 = vadd.f32 %v2383_v21, %v2382_v20  ;;  %v2385_v23 = vpop.f32.mrb[58].mxu1 }
 0x478   : > { %v2386_v24 = vpop.f32.mrb[59].mxu1 }
 0x479   : > { %v2105_v25 = vadd.f32 %v2384_v22, %v3292_v40  ;;  %v2387_v26 = vadd.f32 %v2386_v24, %v2385_v23 }
 0x47b   : > { %2132 = vst.msk [vmem:[%s3299_s25 + $0x60] sm:$0xff] %vm2119_vm0, %v2105_v25  ;;  %v2108_v28 = vadd.f32 %v2387_v26, %v3292_v40 }
 0x47d   : > { %2133 = vst.msk [vmem:[%s3299_s25 + $0x68] sm:$0xff] %vm2119_vm0, %v2108_v28 }
 0x47f   : > { %v2388_v29 = vpop.f32.mrb[60].mxu1 }
 0x480   : > { %v2389_v30 = vpop.f32.mrb[61].mxu1 }
 0x481   : > { %v2390_v31 = vadd.f32 %v2389_v30, %v2388_v29  ;;  %v2391_v33 = vpop.f32.mrb[62].mxu1 }
 0x482   : > { %v2392_v36 = vpop.f32.mrb[63].mxu1 }
 0x483   : > { %v2113_v37 = vadd.f32 %v2390_v31, %v3292_v40  ;;  %v2393_v38 = vadd.f32 %v2392_v36, %v2391_v33 }
 0x485   : > { %2134 = vst.msk [vmem:[%s3299_s25 + $0x70] sm:$0xff] %vm2119_vm0, %v2113_v37  ;;  %v2116_v39 = vadd.f32 %v2393_v38, %v3292_v40 }
 0x487   : > { %2135 = vst.msk [vmem:[%s3299_s25 + $0x78] sm:$0xff] %vm2119_vm0, %v2116_v39 }
 0x488 PF: > { %s22_s17 = sadd.s32 1, %s2636_s17  }
 0x489   : > { %p19_p3 = scmp.ge.s32.totalorder %s22_s17, 6  }
 0x48b   :  { %21 = sbr.rel (!%p19_p3) target bundleno = 1 (0x1), region = 99 }
 0x492   :  { %2158 = vsyncpa [#allocation3], 1 }
 0x493   :  { %2160 = vsyncpa [#allocation3 + $0x1], 1 }

</bundles_post_ra>
